<compile_context>
chip_gen: v6e
topology: v6e:2x2x1
jax: 0.10.0
libtpu: 0.0.40
codegen_flags: <defaults>
</compile_context>

<pallas_src>
import functools
import math

import jax
import jax.numpy as jnp
from jax import lax
from jax.experimental import pallas as pl
from jax.experimental.pallas import tpu as pltpu

LN_EPS = 1e-5

# Matmul operand dtype: bf16 on real TPUs (MXU), f32 fallback elsewhere (avoids the
# unsupported BF16xBF16=F32 dot on CPU / interpret backends).
_ON_TPU = jax.default_backend() == "tpu"
_MM_DTYPE = jnp.bfloat16 if _ON_TPU else jnp.float32


def _layernorm(y, g, b):
    mu = jnp.mean(y, axis=-1, keepdims=True)
    d = y - mu
    var = jnp.mean(d * d, axis=-1, keepdims=True)
    return d * lax.rsqrt(var + LN_EPS) * g + b


# ---------------------------------------------------------------------------
# Pallas kernel: one (batch_tile, layer) grid step of the fused Transformer stack.
# ---------------------------------------------------------------------------
def _transformer_kernel(x_ref,
                        g1_ref, b1_ref,
                        wqkv_ref, bqkv_ref,
                        wo_ref, bo_ref,
                        g2_ref, b2_ref,
                        wfc_ref, bfc_ref,
                        wpr_ref, bpr_ref,
                        o_ref,
                        x_acc_ref,
                        *, n_head, mm_dtype):
    layer = pl.program_id(1)
    n_layers = pl.num_programs(1)

    L, B, E = x_acc_ref.shape
    H = n_head
    Dh = E // H

    # Load the residual stream into the persistent f32 VMEM accumulator at layer 0.
    @pl.when(layer == 0)
    def _():
        x_acc_ref[...] = x_ref[...].astype(jnp.float32)

    # Residual stream flattened to a lane-dense 2-D slab: rows ordered (l, b).
    x2d = x_acc_ref[...].reshape(L * B, E)                    # (L*B, E) f32

    # ---------------- attention branch ----------------
    y = _layernorm(x2d, g1_ref[...], b1_ref[...]).astype(mm_dtype)          # (LB, E)

    # Fused QKV projection: one (LB,E) x (E,3E) GEMM (scale folded into Wq/bq offline).
    qkv = jnp.dot(y, wqkv_ref[...],
                  preferred_element_type=jnp.float32) + bqkv_ref[...]        # (LB, 3E) f32

    # One relayout: (L, B, 3H, Dh) -> (B, 3H, L, Dh), then cheap major-dim slices.
    qkv = jnp.transpose(qkv.astype(mm_dtype).reshape(L, B, 3 * H, Dh),
                        (1, 2, 0, 3))                                        # (B, 3H, L, Dh)
    q = qkv[:, 0 * H:1 * H].reshape(B * H, L, Dh)
    k = qkv[:, 1 * H:2 * H].reshape(B * H, L, Dh)
    v = qkv[:, 2 * H:3 * H].reshape(B * H, L, Dh)

    s = jnp.einsum('bqd,bkd->bqk', q, k,
                   preferred_element_type=jnp.float32)                       # (B*H, L, L) f32
    s = s - jnp.max(s, axis=-1, keepdims=True)
    p = jnp.exp(s)
    p = p * pl.reciprocal(jnp.sum(p, axis=-1, keepdims=True), approx=True)

    ctx = jnp.einsum('bqk,bkd->bqd', p.astype(mm_dtype), v,
                     preferred_element_type=jnp.float32)                     # (B*H, L, Dh)

    # Heads back into the lane dimension -> single K=E output-projection GEMM.
    ctx2d = jnp.transpose(ctx.astype(mm_dtype).reshape(B, H, L, Dh),
                          (2, 0, 1, 3)).reshape(L * B, E)                    # (LB, E)
    attn = jnp.dot(ctx2d, wo_ref[...],
                   preferred_element_type=jnp.float32) + bo_ref[...]
    x1 = x2d + attn

    # ---------------- MLP branch (QuickGELU) ----------------
    y2 = _layernorm(x1, g2_ref[...], b2_ref[...]).astype(mm_dtype)
    h = jnp.dot(y2, wfc_ref[...], preferred_element_type=jnp.float32) + bfc_ref[...]
    h = h * jax.nn.sigmoid(1.702 * h)
    x2 = x1 + jnp.dot(h.astype(mm_dtype), wpr_ref[...],
                      preferred_element_type=jnp.float32) + bpr_ref[...]

    x_acc_ref[...] = x2.reshape(L, B, E)

    @pl.when(layer == n_layers - 1)
    def _():
        o_ref[...] = x2.reshape(L, B, E).astype(o_ref.dtype)


# ---------------------------------------------------------------------------
# pallas_call wrapper
# ---------------------------------------------------------------------------
def _pick_batch_tile(n_batch, target=8):
    """Batch tile: full batch when small; otherwise a sublane-friendly multiple of 8."""
    if n_batch <= target:
        return n_batch
    if n_batch % 8 == 0:
        t = 8
        while t * 2 <= target and n_batch % (t * 2) == 0:
            t *= 2
        return t
    return n_batch  # fall back: whole batch resident (keeps (8,128) constraint happy)


def _transformer_pallas(x_lne, sp, n_head):
    """x_lne: (L, N, E) f32 (PyTorch seq, batch, width — consumed natively).
       sp: dict of layer-stacked, kernel-layout params."""
    L, N, E = x_lne.shape
    n_layers = sp["g1"].shape[0]
    H = n_head
    b_tile = _pick_batch_tile(N)
    B = b_tile

    names = ["g1", "b1", "wqkv", "bqkv", "wo", "bo",
             "g2", "b2", "wfc", "bfc", "wpr", "bpr"]
    weights = [sp[n] for n in names]

    def wspec(arr):
        nd = arr.ndim
        # full per-layer slab, selected by the layer grid index; layer dim squeezed.
        return pl.BlockSpec((None,) + arr.shape[1:],
                            lambda b, l, _nd=nd: (l,) + (0,) * (_nd - 1))

    # --- VMEM budget: double-buffered per-layer weights + activations + residual ---
    mm_size = 2 if _MM_DTYPE is jnp.bfloat16 else 4
    w_bytes = sum(int(w.size // n_layers) * w.dtype.itemsize for w in weights)
    act_bytes = (4 * (B * L * 3 * E            # fused QKV (f32)
                      + 2 * B * H * L * L      # scores + probs (f32)
                      + B * L * E              # ctx (f32)
                      + 5 * B * L * E          # residuals / LN temporaries
                      + B * L * 4 * E)         # MLP hidden (f32)
                 + mm_size * (4 * B * L * E + B * H * L * L + B * L * 4 * E))
    est = 2 * w_bytes + act_bytes + 3 * B * L * E * 4
    if _ON_TPU:
        try:
            cap = int(pltpu.get_tpu_info().vmem_capacity_bytes) * 3 // 4
        except Exception:  # pragma: no cover - info query unavailable
            cap = 96 * 1024 * 1024
    else:
        cap = 96 * 1024 * 1024
    vmem_limit = int(min(max(est + est // 2, 32 * 1024 * 1024), cap))

    # --- advisory cost estimate for the XLA scheduler ---
    flops = n_layers * N * (24 * L * E * E + 4 * L * L * E)
    transcendentals = n_layers * N * (H * L * L + 4 * L * E)
    bytes_accessed = (N // b_tile) * n_layers * w_bytes + 2 * N * L * E * 4

    kernel = functools.partial(_transformer_kernel, n_head=n_head, mm_dtype=_MM_DTYPE)
    return pl.pallas_call(
        kernel,
        out_shape=jax.ShapeDtypeStruct((L, N, E), x_lne.dtype),
        grid_spec=pltpu.PrefetchScalarGridSpec(
            num_scalar_prefetch=0,
            grid=(N // b_tile, n_layers),
            in_specs=[pl.BlockSpec((L, b_tile, E), lambda b, l: (0, b, 0))]
                     + [wspec(w) for w in weights],
            out_specs=pl.BlockSpec((L, b_tile, E), lambda b, l: (0, b, 0)),
            scratch_shapes=[pltpu.VMEM((L, b_tile, E), jnp.float32)],
        ),
        compiler_params=pltpu.CompilerParams(
            dimension_semantics=("parallel", "arbitrary"),
            vmem_limit_bytes=vmem_limit,
        ),
        cost_estimate=pl.CostEstimate(flops=flops,
                                      transcendentals=transcendentals,
                                      bytes_accessed=bytes_accessed),
    )(x_lne, *weights)


def transformer_forward(x_lne, stacked_params, n_head):
    """x_lne: (L, N, E), PyTorch (seq, batch, width) convention — no host transposes."""
    return _transformer_pallas(x_lne, stacked_params, n_head)


# ---------------------------------------------------------------------------
# Parameters
# ---------------------------------------------------------------------------
def init_params(key, width, layers):
    """PyTorch-style per-layer parameters (f32, weights oriented so y @ W = Linear(y))."""
    params = []
    E = width
    std = 0.02
    for l in range(layers):
        ks = jax.random.split(jax.random.fold_in(key, l), 12)
        params.append({
            "ln1_g": jnp.ones((E,), jnp.float32),
            "ln1_b": jnp.zeros((E,), jnp.float32),
            "wq": std * jax.random.normal(ks[0], (E, E), jnp.float32),
            "wk": std * jax.random.normal(ks[1], (E, E), jnp.float32),
            "wv": std * jax.random.normal(ks[2], (E, E), jnp.float32),
            "bq": std * jax.random.normal(ks[3], (E,), jnp.float32),
            "bk": std * jax.random.normal(ks[4], (E,), jnp.float32),
            "bv": std * jax.random.normal(ks[5], (E,), jnp.float32),
            "wo": std * jax.random.normal(ks[6], (E, E), jnp.float32),
            "bo": std * jax.random.normal(ks[7], (E,), jnp.float32),
            "ln2_g": jnp.ones((E,), jnp.float32),
            "ln2_b": jnp.zeros((E,), jnp.float32),
            "wfc": std * jax.random.normal(ks[8], (E, 4 * E), jnp.float32),
            "bfc": std * jax.random.normal(ks[9], (4 * E,), jnp.float32),
            "wpr": std * jax.random.normal(ks[10], (4 * E, E), jnp.float32),
            "bpr": std * jax.random.normal(ks[11], (E,), jnp.float32),
        })
    return params


def prepare_params(params, n_head):
    """One-time host-side conversion to the kernel layout:
       fused Wqkv (E,3E) with 1/sqrt(Dh) folded into the Q columns, lane-dense (1,3E)
       bias, Wo kept (E,E), matmul weights in the backend matmul dtype, biases / LN
       params f32, all stacked over layers on a leading axis."""
    E = params[0]["wq"].shape[0]
    H = n_head
    assert E % H == 0, "width must be divisible by n_head"
    Dh = E // H
    scale = 1.0 / math.sqrt(Dh)

    def per_layer(p):
        wqkv = jnp.concatenate([p["wq"] * scale, p["wk"], p["wv"]], axis=1)   # (E, 3E)
        bqkv = jnp.concatenate([p["bq"] * scale, p["bk"], p["bv"]])           # (3E,)
        return {
            "g1": p["ln1_g"].reshape(1, E),
            "b1": p["ln1_b"].reshape(1, E),
            "wqkv": wqkv.astype(_MM_DTYPE),
            "bqkv": bqkv.reshape(1, 3 * E).astype(jnp.float32),
            "wo": p["wo"].astype(_MM_DTYPE),
            "bo": p["bo"].reshape(1, E),
            "g2": p["ln2_g"].reshape(1, E),
            "b2": p["ln2_b"].reshape(1, E),
            "wfc": p["wfc"].astype(_MM_DTYPE),
            "bfc": p["bfc"].reshape(1, 4 * E),
            "wpr": p["wpr"].astype(_MM_DTYPE),
            "bpr": p["bpr"].reshape(1, E),
        }

    per = [per_layer(p) for p in params]
    return {k: jnp.stack([d[k] for d in per], axis=0) for k in per[0]}


# ---------------------------------------------------------------------------
# Pure-JAX references
# ---------------------------------------------------------------------------
def _ref_mixed(x_lne, sp, n_head):
    """Reference with the SAME matmul dtype / folded scale / fused weights as the kernel."""
    H = n_head
    n_layers = sp["g1"].shape[0]
    x = x_lne.astype(jnp.float32)                      # (L, N, E)
    L, N, E = x.shape
    Dh = E // H
    for l in range(n_layers):
        y = _layernorm(x, sp["g1"][l], sp["b1"][l]).astype(_MM_DTYPE)
        qkv = jnp.einsum('lne,ef->lnf', y, sp["wqkv"][l],
                         preferred_element_type=jnp.float32) + sp["bqkv"][l]
        qkv = qkv.astype(_MM_DTYPE)
        q = qkv[..., 0 * E:1 * E].reshape(L, N, H, Dh)
        k = qkv[..., 1 * E:2 * E].reshape(L, N, H, Dh)
        v = qkv[..., 2 * E:3 * E].reshape(L, N, H, Dh)
        s = jnp.einsum('lnhd,mnhd->nhlm', q, k, preferred_element_type=jnp.float32)
        s = s - jnp.max(s, axis=-1, keepdims=True)
        p = jnp.exp(s)
        p = p / jnp.sum(p, axis=-1, keepdims=True)
        ctx = jnp.einsum('nhlm,mnhd->lnhd', p.astype(_MM_DTYPE), v,
                         preferred_element_type=jnp.float32)
        ctx = ctx.reshape(L, N, E).astype(_MM_DTYPE)
        attn = jnp.einsum('lne,ef->lnf', ctx, sp["wo"][l],
                          preferred_element_type=jnp.float32) + sp["bo"][l]
        x = x + attn
        y2 = _layernorm(x, sp["g2"][l], sp["b2"][l]).astype(_MM_DTYPE)
        h = jnp.einsum('lne,ef->lnf', y2, sp["wfc"][l],
                       preferred_element_type=jnp.float32) + sp["bfc"][l]
        h = h * jax.nn.sigmoid(1.702 * h)
        x = x + jnp.einsum('lnf,fe->lne', h.astype(_MM_DTYPE), sp["wpr"][l],
                           preferred_element_type=jnp.float32) + sp["bpr"][l]
    return x


def _ref_f32(x_lne, params, n_head):
    """Full-f32 reference of the original module semantics (unfused, unscaled weights)."""
    x = jnp.transpose(x_lne, (1, 0, 2)).astype(jnp.float32)    # (N, L, E)
    N, L, E = x.shape
    H = n_head
    Dh = E // H
    for p in params:
        y = _layernorm(x, p["ln1_g"], p["ln1_b"])
        q = (y @ p["wq"] + p["bq"]).reshape(N, L, H, Dh) / math.sqrt(Dh)
        k = (y @ p["wk"] + p["bk"]).reshape(N, L, H, Dh)
        v = (y @ p["wv"] + p["bv"]).reshape(N, L, H, Dh)
        s = jnp.einsum('nqhd,nkhd->nhqk', q, k)
        a = jax.nn.softmax(s, axis=-1)
        ctx = jnp.einsum('nhqk,nkhd->nqhd', a, v).reshape(N, L, E)
        x = x + ctx @ p["wo"] + p["bo"]
        y2 = _layernorm(x, p["ln2_g"], p["ln2_b"])
        h = y2 @ p["wfc"] + p["bfc"]
        h = h * jax.nn.sigmoid(1.702 * h)
        x = x + h @ p["wpr"] + p["bpr"]
    return jnp.transpose(x, (1, 0, 2))


if __name__ == "__main__":
    # Small shapes: width=32, layers=2, heads=4, seq=8, batch=2
    WIDTH, LAYERS, HEADS = 32, 2, 4
    L, N = 8, 2

    key = jax.random.PRNGKey(0)
    kx, kp = jax.random.split(key)
    x = jax.random.normal(kx, (L, N, WIDTH), jnp.float32)      # (seq, batch, width)

    raw_params = init_params(kp, WIDTH, LAYERS)
    kernel_params = prepare_params(raw_params, HEADS)

    out = transformer_forward(x, kernel_params, HEADS)
    out = jax.block_until_ready(out)
    assert out.shape == (L, N, WIDTH)

    # Tight check vs. a pure-JAX reference with identical matmul precision.
    ref_m = _ref_mixed(x, kernel_params, HEADS)
    assert jnp.allclose(out, ref_m, atol=5e-3, rtol=5e-3), \
        "mismatch vs mixed-precision reference"

    # Loose check vs. the original full-f32 module semantics.
    ref_f = _ref_f32(x, raw_params, HEADS)
    assert jnp.allclose(out, ref_f, atol=3e-2, rtol=3e-2), "mismatch vs f32 reference"

    print("KERNEL_OK")
</pallas_src>

<mosaic_0001>
module attributes {stable_mosaic.version = 11 : i64} {
  func.func @_transformer_kernel(%arg0: i32, %arg1: i32, %arg2: memref<8x2x32xf32, #tpu.memory_space<vmem>>, %arg3: memref<1x1x32xf32, #tpu.memory_space<vmem>>, %arg4: memref<1x1x32xf32, #tpu.memory_space<vmem>>, %arg5: memref<1x32x96xf32, #tpu.memory_space<vmem>>, %arg6: memref<1x1x96xf32, #tpu.memory_space<vmem>>, %arg7: memref<1x32x32xf32, #tpu.memory_space<vmem>>, %arg8: memref<1x1x32xf32, #tpu.memory_space<vmem>>, %arg9: memref<1x1x32xf32, #tpu.memory_space<vmem>>, %arg10: memref<1x1x32xf32, #tpu.memory_space<vmem>>, %arg11: memref<1x32x128xf32, #tpu.memory_space<vmem>>, %arg12: memref<1x1x128xf32, #tpu.memory_space<vmem>>, %arg13: memref<1x128x32xf32, #tpu.memory_space<vmem>>, %arg14: memref<1x1x32xf32, #tpu.memory_space<vmem>>, %arg15: memref<8x2x32xf32, #tpu.memory_space<vmem>>, %arg16: memref<8x2x32xf32, #tpu.memory_space<vmem>>) attributes {dimension_semantics = [#tpu.dimension_semantics<parallel>, #tpu.dimension_semantics<arbitrary>], iteration_bounds = array<i64: 1, 2>, scalar_prefetch = 0 : i64, scratch_operands = 1 : i64, tpu.core_type = #tpu.core_type<tc>, window_params = [{transform_indices = @transform_0, window_bounds = array<i64: 8, 2, 32>}, {transform_indices = @transform_1, window_bounds = array<i64: 1, 1, 32>}, {transform_indices = @transform_2, window_bounds = array<i64: 1, 1, 32>}, {transform_indices = @transform_3, window_bounds = array<i64: 1, 32, 96>}, {transform_indices = @transform_4, window_bounds = array<i64: 1, 1, 96>}, {transform_indices = @transform_5, window_bounds = array<i64: 1, 32, 32>}, {transform_indices = @transform_6, window_bounds = array<i64: 1, 1, 32>}, {transform_indices = @transform_7, window_bounds = array<i64: 1, 1, 32>}, {transform_indices = @transform_8, window_bounds = array<i64: 1, 1, 32>}, {transform_indices = @transform_9, window_bounds = array<i64: 1, 32, 128>}, {transform_indices = @transform_10, window_bounds = array<i64: 1, 1, 128>}, {transform_indices = @transform_11, window_bounds = array<i64: 1, 128, 32>}, {transform_indices = @transform_12, window_bounds = array<i64: 1, 1, 32>}, {transform_indices = @transform_13, window_bounds = array<i64: 8, 2, 32>}]} {
    %c0_i32 = arith.constant 0 : i32
    %0 = arith.cmpi eq, %arg1, %c0_i32 : i32
    %1 = arith.extui %0 : i1 to i32
    %c0_i32_0 = arith.constant 0 : i32
    %2 = arith.cmpi ne, %1, %c0_i32_0 : i32
    scf.if %2 {
      %c0_62 = arith.constant 0 : index
      %c0_63 = arith.constant 0 : index
      %c0_64 = arith.constant 0 : index
      %119 = vector.load %arg2[%c0_62, %c0_63, %c0_64] : memref<8x2x32xf32, #tpu.memory_space<vmem>>, vector<8x2x32xf32>
      %c0_65 = arith.constant 0 : index
      %c0_66 = arith.constant 0 : index
      %c0_67 = arith.constant 0 : index
      %120 = vector.load %arg16[%c0_65, %c0_66, %c0_67] : memref<8x2x32xf32, #tpu.memory_space<vmem>>, vector<8x2x32xf32>
      tpu.vector_store %arg16[%c0_65, %c0_66, %c0_67], %119 {strides = array<i32>} : memref<8x2x32xf32, #tpu.memory_space<vmem>>, vector<8x2x32xf32>,
    } else {
    }
    %c0 = arith.constant 0 : index
    %c0_1 = arith.constant 0 : index
    %c0_2 = arith.constant 0 : index
    %3 = vector.load %arg16[%c0, %c0_1, %c0_2] : memref<8x2x32xf32, #tpu.memory_space<vmem>>, vector<8x2x32xf32>
    %4 = vector.shape_cast %3 : vector<8x2x32xf32> to vector<16x32xf32>
    %c0_3 = arith.constant 0 : index
    %c0_4 = arith.constant 0 : index
    %c0_5 = arith.constant 0 : index
    %5 = vector.load %arg3[%c0_3, %c0_4, %c0_5] : memref<1x1x32xf32, #tpu.memory_space<vmem>>, vector<1x1x32xf32>
    %6 = vector.shape_cast %5 : vector<1x1x32xf32> to vector<1x32xf32>
    %c0_6 = arith.constant 0 : index
    %c0_7 = arith.constant 0 : index
    %c0_8 = arith.constant 0 : index
    %7 = vector.load %arg4[%c0_6, %c0_7, %c0_8] : memref<1x1x32xf32, #tpu.memory_space<vmem>>, vector<1x1x32xf32>
    %8 = vector.shape_cast %7 : vector<1x1x32xf32> to vector<1x32xf32>
    %cst = arith.constant dense<0.000000e+00> : vector<16xf32>
    %9 = vector.multi_reduction <add>, %4, %cst [1] : vector<16x32xf32> to vector<16xf32>
    %10 = vector.shape_cast %9 : vector<16xf32> to vector<16x1xf32>
    %cst_9 = arith.constant 3.200000e+01 : f32
    %11 = vector.broadcast %cst_9 : f32 to vector<16x1xf32>
    %12 = arith.divf %10, %11 : vector<16x1xf32>
    %13 = vector.broadcast %12 : vector<16x1xf32> to vector<16x32xf32>
    %14 = arith.subf %4, %13 : vector<16x32xf32>
    %15 = arith.mulf %14, %14 : vector<16x32xf32>
    %cst_10 = arith.constant dense<0.000000e+00> : vector<16xf32>
    %16 = vector.multi_reduction <add>, %15, %cst_10 [1] : vector<16x32xf32> to vector<16xf32>
    %17 = vector.shape_cast %16 : vector<16xf32> to vector<16x1xf32>
    %cst_11 = arith.constant 3.200000e+01 : f32
    %18 = vector.broadcast %cst_11 : f32 to vector<16x1xf32>
    %19 = arith.divf %17, %18 : vector<16x1xf32>
    %cst_12 = arith.constant 9.99999974E-6 : f32
    %20 = vector.broadcast %cst_12 : f32 to vector<16x1xf32>
    %21 = arith.addf %19, %20 : vector<16x1xf32>
    %22 = math.rsqrt %21 : vector<16x1xf32>
    %23 = vector.broadcast %22 : vector<16x1xf32> to vector<16x32xf32>
    %24 = arith.mulf %14, %23 : vector<16x32xf32>
    %25 = vector.broadcast %6 : vector<1x32xf32> to vector<16x32xf32>
    %26 = arith.mulf %24, %25 : vector<16x32xf32>
    %27 = vector.broadcast %8 : vector<1x32xf32> to vector<16x32xf32>
    %28 = arith.addf %26, %27 : vector<16x32xf32>
    %c0_13 = arith.constant 0 : index
    %c0_14 = arith.constant 0 : index
    %c0_15 = arith.constant 0 : index
    %29 = vector.load %arg5[%c0_13, %c0_14, %c0_15] : memref<1x32x96xf32, #tpu.memory_space<vmem>>, vector<1x32x96xf32>
    %30 = vector.shape_cast %29 : vector<1x32x96xf32> to vector<32x96xf32>
    %cst_16 = arith.constant dense<0.000000e+00> : vector<16x96xf32>
    %31 = tpu.matmul %28, %30, %cst_16 {dimension_numbers = #tpu.dot_dimension_numbers<[1], [0], [0], [1], [0, 0, 1, 1], [], []>} : vector<16x32xf32>, vector<32x96xf32>, vector<16x96xf32> -> vector<16x96xf32>
    %c0_17 = arith.constant 0 : index
    %c0_18 = arith.constant 0 : index
    %c0_19 = arith.constant 0 : index
    %32 = vector.load %arg6[%c0_17, %c0_18, %c0_19] : memref<1x1x96xf32, #tpu.memory_space<vmem>>, vector<1x1x96xf32>
    %33 = vector.shape_cast %32 : vector<1x1x96xf32> to vector<1x96xf32>
    %34 = vector.broadcast %33 : vector<1x96xf32> to vector<16x96xf32>
    %35 = arith.addf %31, %34 : vector<16x96xf32>
    %36 = vector.shape_cast %35 : vector<16x96xf32> to vector<8x2x12x8xf32>
    %37 = tpu.transpose %36, [1, 2, 0, 3] : vector<8x2x12x8xf32> -> vector<2x12x8x8xf32>
    %38 = vector.extract_strided_slice %37 {offsets = [0, 0, 0, 0], sizes = [2, 4, 8, 8], strides = [1, 1, 1, 1]} : vector<2x12x8x8xf32> to vector<2x4x8x8xf32>
    %39 = vector.shape_cast %38 : vector<2x4x8x8xf32> to vector<8x8x8xf32>
    %40 = vector.extract_strided_slice %37 {offsets = [0, 4, 0, 0], sizes = [2, 4, 8, 8], strides = [1, 1, 1, 1]} : vector<2x12x8x8xf32> to vector<2x4x8x8xf32>
    %41 = vector.shape_cast %40 : vector<2x4x8x8xf32> to vector<8x8x8xf32>
    %42 = vector.extract_strided_slice %37 {offsets = [0, 8, 0, 0], sizes = [2, 4, 8, 8], strides = [1, 1, 1, 1]} : vector<2x12x8x8xf32> to vector<2x4x8x8xf32>
    %43 = vector.shape_cast %42 : vector<2x4x8x8xf32> to vector<8x8x8xf32>
    "tpu.trace_start"() <{level = 10 : i32, message = "bqd,bkd->bqk"}> : () -> ()
    %cst_20 = arith.constant dense<0.000000e+00> : vector<8x8x8xf32>
    %44 = tpu.matmul %39, %41, %cst_20 {dimension_numbers = #tpu.dot_dimension_numbers<[2], [2], [1], [1], [0, 0, 0, 1, 1, 1], [0], [0]>} : vector<8x8x8xf32>, vector<8x8x8xf32>, vector<8x8x8xf32> -> vector<8x8x8xf32>
    "tpu.trace_stop"() : () -> ()
    %cst_21 = arith.constant dense<0xFF800000> : vector<8x8xf32>
    %45 = vector.multi_reduction <maximumf>, %44, %cst_21 [2] : vector<8x8x8xf32> to vector<8x8xf32>
    %46 = vector.shape_cast %45 : vector<8x8xf32> to vector<8x8x1xf32>
    %47 = vector.broadcast %46 : vector<8x8x1xf32> to vector<8x8x8xf32>
    %48 = arith.subf %44, %47 : vector<8x8x8xf32>
    %49 = math.exp %48 : vector<8x8x8xf32>
    %cst_22 = arith.constant dense<0.000000e+00> : vector<8x8xf32>
    %50 = vector.multi_reduction <add>, %49, %cst_22 [2] : vector<8x8x8xf32> to vector<8x8xf32>
    %51 = vector.shape_cast %50 : vector<8x8xf32> to vector<8x8x1xf32>
    %52 = tpu.reciprocal %51 {approx = true} : vector<8x8x1xf32> -> vector<8x8x1xf32>
    %53 = vector.broadcast %52 : vector<8x8x1xf32> to vector<8x8x8xf32>
    %54 = arith.mulf %49, %53 : vector<8x8x8xf32>
    "tpu.trace_start"() <{level = 10 : i32, message = "bqk,bkd->bqd"}> : () -> ()
    %cst_23 = arith.constant dense<0.000000e+00> : vector<8x8x8xf32>
    %55 = tpu.matmul %54, %43, %cst_23 {dimension_numbers = #tpu.dot_dimension_numbers<[2], [1], [1], [2], [0, 0, 0, 1, 1, 2], [0], [0]>} : vector<8x8x8xf32>, vector<8x8x8xf32>, vector<8x8x8xf32> -> vector<8x8x8xf32>
    "tpu.trace_stop"() : () -> ()
    %56 = vector.shape_cast %55 : vector<8x8x8xf32> to vector<2x4x8x8xf32>
    %57 = tpu.transpose %56, [2, 0, 1, 3] : vector<2x4x8x8xf32> -> vector<8x2x4x8xf32>
    %58 = vector.shape_cast %57 : vector<8x2x4x8xf32> to vector<16x32xf32>
    %c0_24 = arith.constant 0 : index
    %c0_25 = arith.constant 0 : index
    %c0_26 = arith.constant 0 : index
    %59 = vector.load %arg7[%c0_24, %c0_25, %c0_26] : memref<1x32x32xf32, #tpu.memory_space<vmem>>, vector<1x32x32xf32>
    %60 = vector.shape_cast %59 : vector<1x32x32xf32> to vector<32x32xf32>
    %cst_27 = arith.constant dense<0.000000e+00> : vector<16x32xf32>
    %61 = tpu.matmul %58, %60, %cst_27 {dimension_numbers = #tpu.dot_dimension_numbers<[1], [0], [0], [1], [0, 0, 1, 1], [], []>} : vector<16x32xf32>, vector<32x32xf32>, vector<16x32xf32> -> vector<16x32xf32>
    %c0_28 = arith.constant 0 : index
    %c0_29 = arith.constant 0 : index
    %c0_30 = arith.constant 0 : index
    %62 = vector.load %arg8[%c0_28, %c0_29, %c0_30] : memref<1x1x32xf32, #tpu.memory_space<vmem>>, vector<1x1x32xf32>
    %63 = vector.shape_cast %62 : vector<1x1x32xf32> to vector<1x32xf32>
    %64 = vector.broadcast %63 : vector<1x32xf32> to vector<16x32xf32>
    %65 = arith.addf %61, %64 : vector<16x32xf32>
    %66 = arith.addf %4, %65 : vector<16x32xf32>
    %c0_31 = arith.constant 0 : index
    %c0_32 = arith.constant 0 : index
    %c0_33 = arith.constant 0 : index
    %67 = vector.load %arg9[%c0_31, %c0_32, %c0_33] : memref<1x1x32xf32, #tpu.memory_space<vmem>>, vector<1x1x32xf32>
    %68 = vector.shape_cast %67 : vector<1x1x32xf32> to vector<1x32xf32>
    %c0_34 = arith.constant 0 : index
    %c0_35 = arith.constant 0 : index
    %c0_36 = arith.constant 0 : index
    %69 = vector.load %arg10[%c0_34, %c0_35, %c0_36] : memref<1x1x32xf32, #tpu.memory_space<vmem>>, vector<1x1x32xf32>
    %70 = vector.shape_cast %69 : vector<1x1x32xf32> to vector<1x32xf32>
    %cst_37 = arith.constant dense<0.000000e+00> : vector<16xf32>
    %71 = vector.multi_reduction <add>, %66, %cst_37 [1] : vector<16x32xf32> to vector<16xf32>
    %72 = vector.shape_cast %71 : vector<16xf32> to vector<16x1xf32>
    %cst_38 = arith.constant 3.200000e+01 : f32
    %73 = vector.broadcast %cst_38 : f32 to vector<16x1xf32>
    %74 = arith.divf %72, %73 : vector<16x1xf32>
    %75 = vector.broadcast %74 : vector<16x1xf32> to vector<16x32xf32>
    %76 = arith.subf %66, %75 : vector<16x32xf32>
    %77 = arith.mulf %76, %76 : vector<16x32xf32>
    %cst_39 = arith.constant dense<0.000000e+00> : vector<16xf32>
    %78 = vector.multi_reduction <add>, %77, %cst_39 [1] : vector<16x32xf32> to vector<16xf32>
    %79 = vector.shape_cast %78 : vector<16xf32> to vector<16x1xf32>
    %cst_40 = arith.constant 3.200000e+01 : f32
    %80 = vector.broadcast %cst_40 : f32 to vector<16x1xf32>
    %81 = arith.divf %79, %80 : vector<16x1xf32>
    %cst_41 = arith.constant 9.99999974E-6 : f32
    %82 = vector.broadcast %cst_41 : f32 to vector<16x1xf32>
    %83 = arith.addf %81, %82 : vector<16x1xf32>
    %84 = math.rsqrt %83 : vector<16x1xf32>
    %85 = vector.broadcast %84 : vector<16x1xf32> to vector<16x32xf32>
    %86 = arith.mulf %76, %85 : vector<16x32xf32>
    %87 = vector.broadcast %68 : vector<1x32xf32> to vector<16x32xf32>
    %88 = arith.mulf %86, %87 : vector<16x32xf32>
    %89 = vector.broadcast %70 : vector<1x32xf32> to vector<16x32xf32>
    %90 = arith.addf %88, %89 : vector<16x32xf32>
    %c0_42 = arith.constant 0 : index
    %c0_43 = arith.constant 0 : index
    %c0_44 = arith.constant 0 : index
    %91 = vector.load %arg11[%c0_42, %c0_43, %c0_44] : memref<1x32x128xf32, #tpu.memory_space<vmem>>, vector<1x32x128xf32>
    %92 = vector.shape_cast %91 : vector<1x32x128xf32> to vector<32x128xf32>
    %cst_45 = arith.constant dense<0.000000e+00> : vector<16x128xf32>
    %93 = tpu.matmul %90, %92, %cst_45 {dimension_numbers = #tpu.dot_dimension_numbers<[1], [0], [0], [1], [0, 0, 1, 1], [], []>} : vector<16x32xf32>, vector<32x128xf32>, vector<16x128xf32> -> vector<16x128xf32>
    %c0_46 = arith.constant 0 : index
    %c0_47 = arith.constant 0 : index
    %c0_48 = arith.constant 0 : index
    %94 = vector.load %arg12[%c0_46, %c0_47, %c0_48] : memref<1x1x128xf32, #tpu.memory_space<vmem>>, vector<1x1x128xf32>
    %95 = vector.shape_cast %94 : vector<1x1x128xf32> to vector<1x128xf32>
    %96 = vector.broadcast %95 : vector<1x128xf32> to vector<16x128xf32>
    %97 = arith.addf %93, %96 : vector<16x128xf32>
    %cst_49 = arith.constant 1.702000e+00 : f32
    %98 = vector.broadcast %cst_49 : f32 to vector<16x128xf32>
    %99 = arith.mulf %98, %97 : vector<16x128xf32>
    %100 = arith.negf %99 : vector<16x128xf32>
    %101 = math.exp %100 : vector<16x128xf32>
    %cst_50 = arith.constant 1.000000e+00 : f32
    %102 = vector.broadcast %cst_50 : f32 to vector<16x128xf32>
    %103 = arith.addf %102, %101 : vector<16x128xf32>
    %104 = arith.divf %102, %103 : vector<16x128xf32>
    %105 = arith.mulf %97, %104 : vector<16x128xf32>
    %c0_51 = arith.constant 0 : index
    %c0_52 = arith.constant 0 : index
    %c0_53 = arith.constant 0 : index
    %106 = vector.load %arg13[%c0_51, %c0_52, %c0_53] : memref<1x128x32xf32, #tpu.memory_space<vmem>>, vector<1x128x32xf32>
    %107 = vector.shape_cast %106 : vector<1x128x32xf32> to vector<128x32xf32>
    %cst_54 = arith.constant dense<0.000000e+00> : vector<16x32xf32>
    %108 = tpu.matmul %105, %107, %cst_54 {dimension_numbers = #tpu.dot_dimension_numbers<[1], [0], [0], [1], [0, 0, 1, 1], [], []>} : vector<16x128xf32>, vector<128x32xf32>, vector<16x32xf32> -> vector<16x32xf32>
    %109 = arith.addf %66, %108 : vector<16x32xf32>
    %c0_55 = arith.constant 0 : index
    %c0_56 = arith.constant 0 : index
    %c0_57 = arith.constant 0 : index
    %110 = vector.load %arg14[%c0_55, %c0_56, %c0_57] : memref<1x1x32xf32, #tpu.memory_space<vmem>>, vector<1x1x32xf32>
    %111 = vector.shape_cast %110 : vector<1x1x32xf32> to vector<1x32xf32>
    %112 = vector.broadcast %111 : vector<1x32xf32> to vector<16x32xf32>
    %113 = arith.addf %109, %112 : vector<16x32xf32>
    %114 = vector.shape_cast %113 : vector<16x32xf32> to vector<8x2x32xf32>
    %c0_58 = arith.constant 0 : index
    %c0_59 = arith.constant 0 : index
    %c0_60 = arith.constant 0 : index
    %115 = vector.load %arg16[%c0_58, %c0_59, %c0_60] : memref<8x2x32xf32, #tpu.memory_space<vmem>>, vector<8x2x32xf32>
    tpu.vector_store %arg16[%c0_58, %c0_59, %c0_60], %114 {strides = array<i32>} : memref<8x2x32xf32, #tpu.memory_space<vmem>>, vector<8x2x32xf32>,
    %c1_i32 = arith.constant 1 : i32
    %116 = arith.cmpi eq, %arg1, %c1_i32 : i32
    %117 = arith.extui %116 : i1 to i32
    %c0_i32_61 = arith.constant 0 : i32
    %118 = arith.cmpi ne, %117, %c0_i32_61 : i32
    scf.if %118 {
      %119 = vector.shape_cast %113 : vector<16x32xf32> to vector<8x2x32xf32>
      %c0_62 = arith.constant 0 : index
      %c0_63 = arith.constant 0 : index
      %c0_64 = arith.constant 0 : index
      %120 = vector.load %arg15[%c0_62, %c0_63, %c0_64] : memref<8x2x32xf32, #tpu.memory_space<vmem>>, vector<8x2x32xf32>
      tpu.vector_store %arg15[%c0_62, %c0_63, %c0_64], %119 {strides = array<i32>} : memref<8x2x32xf32, #tpu.memory_space<vmem>>, vector<8x2x32xf32>,
    } else {
    }
    return
  }
  func.func @transform_0(%arg0: i32, %arg1: i32) -> (i32, i32, i32) {
    %c0_i32 = arith.constant 0 : i32
    %c0_i32_0 = arith.constant 0 : i32
    %c0_i32_1 = arith.constant 0 : i32
    return %c0_i32, %arg0, %c0_i32_0 : i32, i32, i32
  }
  func.func @transform_1(%arg0: i32, %arg1: i32) -> (i32, i32, i32) {
    %c0_i32 = arith.constant 0 : i32
    %c0_i32_0 = arith.constant 0 : i32
    %c0_i32_1 = arith.constant 0 : i32
    return %arg1, %c0_i32, %c0_i32_0 : i32, i32, i32
  }
  func.func @transform_2(%arg0: i32, %arg1: i32) -> (i32, i32, i32) {
    %c0_i32 = arith.constant 0 : i32
    %c0_i32_0 = arith.constant 0 : i32
    %c0_i32_1 = arith.constant 0 : i32
    return %arg1, %c0_i32, %c0_i32_0 : i32, i32, i32
  }
  func.func @transform_3(%arg0: i32, %arg1: i32) -> (i32, i32, i32) {
    %c0_i32 = arith.constant 0 : i32
    %c0_i32_0 = arith.constant 0 : i32
    %c0_i32_1 = arith.constant 0 : i32
    return %arg1, %c0_i32, %c0_i32_0 : i32, i32, i32
  }
  func.func @transform_4(%arg0: i32, %arg1: i32) -> (i32, i32, i32) {
    %c0_i32 = arith.constant 0 : i32
    %c0_i32_0 = arith.constant 0 : i32
    %c0_i32_1 = arith.constant 0 : i32
    return %arg1, %c0_i32, %c0_i32_0 : i32, i32, i32
  }
  func.func @transform_5(%arg0: i32, %arg1: i32) -> (i32, i32, i32) {
    %c0_i32 = arith.constant 0 : i32
    %c0_i32_0 = arith.constant 0 : i32
    %c0_i32_1 = arith.constant 0 : i32
    return %arg1, %c0_i32, %c0_i32_0 : i32, i32, i32
  }
  func.func @transform_6(%arg0: i32, %arg1: i32) -> (i32, i32, i32) {
    %c0_i32 = arith.constant 0 : i32
    %c0_i32_0 = arith.constant 0 : i32
    %c0_i32_1 = arith.constant 0 : i32
    return %arg1, %c0_i32, %c0_i32_0 : i32, i32, i32
  }
  func.func @transform_7(%arg0: i32, %arg1: i32) -> (i32, i32, i32) {
    %c0_i32 = arith.constant 0 : i32
    %c0_i32_0 = arith.constant 0 : i32
    %c0_i32_1 = arith.constant 0 : i32
    return %arg1, %c0_i32, %c0_i32_0 : i32, i32, i32
  }
  func.func @transform_8(%arg0: i32, %arg1: i32) -> (i32, i32, i32) {
    %c0_i32 = arith.constant 0 : i32
    %c0_i32_0 = arith.constant 0 : i32
    %c0_i32_1 = arith.constant 0 : i32
    return %arg1, %c0_i32, %c0_i32_0 : i32, i32, i32
  }
  func.func @transform_9(%arg0: i32, %arg1: i32) -> (i32, i32, i32) {
    %c0_i32 = arith.constant 0 : i32
    %c0_i32_0 = arith.constant 0 : i32
    %c0_i32_1 = arith.constant 0 : i32
    return %arg1, %c0_i32, %c0_i32_0 : i32, i32, i32
  }
  func.func @transform_10(%arg0: i32, %arg1: i32) -> (i32, i32, i32) {
    %c0_i32 = arith.constant 0 : i32
    %c0_i32_0 = arith.constant 0 : i32
    %c0_i32_1 = arith.constant 0 : i32
    return %arg1, %c0_i32, %c0_i32_0 : i32, i32, i32
  }
  func.func @transform_11(%arg0: i32, %arg1: i32) -> (i32, i32, i32) {
    %c0_i32 = arith.constant 0 : i32
    %c0_i32_0 = arith.constant 0 : i32
    %c0_i32_1 = arith.constant 0 : i32
    return %arg1, %c0_i32, %c0_i32_0 : i32, i32, i32
  }
  func.func @transform_12(%arg0: i32, %arg1: i32) -> (i32, i32, i32) {
    %c0_i32 = arith.constant 0 : i32
    %c0_i32_0 = arith.constant 0 : i32
    %c0_i32_1 = arith.constant 0 : i32
    return %arg1, %c0_i32, %c0_i32_0 : i32, i32, i32
  }
  func.func @transform_13(%arg0: i32, %arg1: i32) -> (i32, i32, i32) {
    %c0_i32 = arith.constant 0 : i32
    %c0_i32_0 = arith.constant 0 : i32
    %c0_i32_1 = arith.constant 0 : i32
    return %c0_i32, %arg0, %c0_i32_0 : i32, i32, i32
  }
}

</mosaic_0001>

<bundles_post_ra>
// kernel: tpu_custom_call.1
= control target key start
LH: loop header
LB: loop body
LE: loop exit
PB: predicated region body
PF: predicated region fallthrough
CT: control target
= control target key end

     0   :  { %s5896_s0 = inlined_call_operand.vmem [shape: f32[8,2,32], index: 0, kind: input, shape index: {}]   ;;  %s5897_s1 = inlined_call_operand.vmem [shape: f32[2,1,32], index: 1, kind: input, shape index: {}]   ;;  %s5898_s2 = inlined_call_operand.vmem [shape: f32[2,1,32], index: 2, kind: input, shape index: {}]   ;;  %s5899_s3 = inlined_call_operand.vmem [shape: f32[2,32,96], index: 3, kind: input, shape index: {}]   ;;  %s5900_s4 = inlined_call_operand.vmem [shape: f32[2,1,96], index: 4, kind: input, shape index: {}]   ;;  %s5901_s5 = inlined_call_operand.vmem [shape: f32[2,32,32], index: 5, kind: input, shape index: {}]   ;;  %s5902_s6 = inlined_call_operand.vmem [shape: f32[2,1,32], index: 6, kind: input, shape index: {}]   ;;  %s5903_s7 = inlined_call_operand.vmem [shape: f32[2,1,32], index: 7, kind: input, shape index: {}]   ;;  %s5904_s8 = inlined_call_operand.vmem [shape: f32[2,1,32], index: 8, kind: input, shape index: {}]   ;;  %s5905_s9 = inlined_call_operand.vmem [shape: f32[2,32,128], index: 9, kind: input, shape index: {}]   ;;  %s5906_s10 = inlined_call_operand.vmem [shape: f32[2,1,128], index: 10, kind: input, shape index: {}]   ;;  %s5907_s11 = inlined_call_operand.vmem [shape: f32[2,128,32], index: 11, kind: input, shape index: {}]   ;;  %s5908_s12 = inlined_call_operand.vmem [shape: f32[2,1,32], index: 12, kind: input, shape index: {}]   ;;  %s5909_s13 = inlined_call_operand.hbm [shape: f32[8,2,32], index: 13, kind: output, shape index: {}]  }
   0x1   :  { %5913 = sst [smem:[#allocation10_spill]] %s5899_s3 }
   0x2   :  { %5914 = sst [smem:[#allocation11_spill]] %s5901_s5 }
   0x3   :  { %5915 = sst [smem:[#allocation12_spill]] %s5909_s13 }
   0x4   :  { %18 = vsyncpa [#allocation4], 0  ;;  %s5165_s25 = smov 0   ;;  %s5167_s26 = smov 0  }
   0x5   :  { %s5169_s27 = smov 0  }
   0x6 LB: > { %5916 = sst [smem:[#allocation6_spill]] %s5064_s26  ;;  %s33_s29 = sadd.s32 1, %s5064_s26  ;;  %s5068_s27 = sphi %s5169_s27, %s24_s27   ;;  %s5064_s26 = sphi %s5167_s26, %s5933_s26   ;;  %s5060_s25 = sphi %s5165_s25, %s5932_s25  }
   0x7   : > { %5917 = sst [smem:[#allocation7_spill]] %s5068_s27  ;;  %p34_p0 = scmp.ge.s32.totalorder %s33_s29, 2 }
   0x8   : > { %p4612_p1 = scmp.ge.s32.totalorder %s5068_s27, 1  ;;  %p503_p2 = scmp.lt.s32.totalorder %s5068_s27, 3 }
   0x9   : > { %s5935_s29 = smov (%p34_p0, %s33_s29), 0 }
   0xa   : > { %5918 = sst [smem:[#allocation8_spill]] %s5935_s29  ;;  %p504_p3 = pnand %p4612_p1, %p503_p2 }
   0xc   : > { %507 = sbr.rel (%p504_p3) target bundleno = 2610 (0xa32), region = 72 }
  0x11   : > { %p589_p4 = scmp.lt.s32.totalorder %s5060_s25, 1  ;;  %s5919_s3 = sld [smem:[#allocation10_spill]] }
  0x12   : > { %s5920_s5 = sld [smem:[#allocation11_spill]]  ;;  %p4621_p5 = scmp.ne.s32.totalorder %s5060_s25, 0 }
  0x13   : > { %s5188_s30 = scalar_select %p589_p4, %s5060_s25, 1 }
  0x15   : > { %s4687_s20 = sshll.u32 %s5188_s30, 5  ;;  %s613_s27 = scalar_lea.vmem %s5903_s7, %s5188_s30 }
  0x16   : > { %s616_s23 = scalar_lea.vmem %s5904_s8, %s5188_s30  ;;  %s632_s21 = scalar_lea.vmem %s5908_s12, %s5188_s30 }
  0x17   : > { %s5206_s15 = scalar_lea.vmem %s5919_s3, %s4687_s20  ;;  %s5228_s3 = scalar_lea.vmem %s5905_s9, %s4687_s20 }
  0x18   : > { %s5211_s26 = scalar_lea.vmem %s5920_s5, %s4687_s20  ;;  %s624_s5 = scalar_lea.vmem %s5906_s10, %s5188_s30 }
  0x19   : > { %5921 = sst [smem:[#allocation9_spill]] %s5211_s26  ;;  %s4690_s26 = sshll.u32 %s5188_s30, 7 }
  0x1a   : > { %s5238_s17 = scalar_lea.vmem %s5907_s11, %s4690_s26  ;;  %636 = sbr.rel (%p4621_p5) target bundleno = 37 (0x25), region = 76 }
  0x1f   : > { %v637_v0 = vld [vmem:[%s5896_s0] sm:$0x3]  ;;  %vm645_vm0 = vcmask 254976   ;;  %v638_v1 = vld [vmem:[%s5896_s0 + $0x2] sm:$0x3] }
  0x20   : > { %646 = vst.msk [vmem:[#allocation2] sm:$0x3] %vm645_vm0, %v637_v0  ;;  %647 = vst.msk [vmem:[#allocation2 + $0x2] sm:$0x3] %vm645_vm0, %v638_v1  ;;  %v639_v2 = vld [vmem:[%s5896_s0 + $0x4] sm:$0x3] }
  0x21   : > { %v640_v3 = vld [vmem:[%s5896_s0 + $0x6] sm:$0x3]  ;;  %v641_v4 = vld [vmem:[%s5896_s0 + $0x8] sm:$0x3]  ;;  %648 = vst.msk [vmem:[#allocation2 + $0x4] sm:$0x3] %vm645_vm0, %v639_v2 }
  0x22   : > { %649 = vst.msk [vmem:[#allocation2 + $0x6] sm:$0x3] %vm645_vm0, %v640_v3  ;;  %650 = vst.msk [vmem:[#allocation2 + $0x8] sm:$0x3] %vm645_vm0, %v641_v4  ;;  %v642_v5 = vld [vmem:[%s5896_s0 + $0xa] sm:$0x3] }
  0x23   : > { %v643_v6 = vld [vmem:[%s5896_s0 + $0xc] sm:$0x3]  ;;  %v644_v7 = vld [vmem:[%s5896_s0 + $0xe] sm:$0x3]  ;;  %651 = vst.msk [vmem:[#allocation2 + $0xa] sm:$0x3] %vm645_vm0, %v642_v5 }
  0x24   : > { %652 = vst.msk [vmem:[#allocation2 + $0xc] sm:$0x3] %vm645_vm0, %v643_v6  ;;  %653 = vst.msk [vmem:[#allocation2 + $0xe] sm:$0x3] %vm645_vm0, %v644_v7 }
  0x25 PF: > { %v677_v10 = vlaneseq  ;;  %v5070_v13 = vmov 1983009808   ;;  %vm708_vm1 = vcmask 261120   ;;  %v5071_v34 = vmov 269488144   ;;  %s5922_s13 = scalar_lea.vmem %s5897_s1, %s5188_s30  ;;  %s5923_s18 = scalar_lea.vmem %s5898_s2, %s5188_s30 }
  0x26   : > { %v675_v14 = vunpack.c.l.s4 %v5070_v13  ;;  %v721_v35 = vunpack.c.l.s4 %v5071_v34  ;;  %v5072_v36 = vmov 842150450   ;;  %v5073_v38 = vmov 1414812756   ;;  %s5924_s20 = scalar_lea.vmem %s5900_s4, %s5188_s30  ;;  %s5075_s24 = smov 96  }
  0x27   : > { %v654_v8 = vld [vmem:[#allocation2] sm:$0x3]  ;;  %v655_v9 = vld [vmem:[#allocation2 + $0x2] sm:$0x3]  ;;  %v5269_v15 = vshrl.u32 %v677_v10, 7  ;;  %v728_v37 = vunpack.c.l.s4 %v5072_v36  ;;  %v735_v39 = vunpack.c.l.s4 %v5073_v38  ;;  %s5076_s14 = smov 88  }
  0x28   : > { %v656_v11 = vld [vmem:[#allocation2 + $0x4] sm:$0x3]  ;;  %v672_v18 = vcombine.low %v654_v8, %v655_v9  ;;  %v676_v22 = vunpack.c.0.s8 %v675_v14  ;;  %v5074_v40 = vmov 1987475062   ;;  %v722_v42 = vunpack.c.0.s8 %v721_v35  ;;  %v4622_v38 = vld [vmem:[%s5922_s13] ss:$0 sm:$0xff] }
  0x29   : > { %v657_v12 = vld [vmem:[#allocation2 + $0x6] sm:$0x3]  ;;  %v658_v16 = vld [vmem:[#allocation2 + $0x8] sm:$0x3]  ;;  %v742_v41 = vunpack.c.l.s4 %v5074_v40  ;;  %v729_v43 = vunpack.c.0.s8 %v728_v37  ;;  %v736_v44 = vunpack.c.0.s8 %v735_v39  ;;  %v4623_v39 = vld [vmem:[%s5923_s18] ss:$0 sm:$0xff]  ;;  %v935_v40 = vcombine.high %v4622_v38, %v4622_v38 }
  0x2a   : > { %v659_v17 = vld [vmem:[#allocation2 + $0xa] sm:$0x3]  ;;  %v673_v21 = vcombine.low %v656_v11, %v657_v12  ;;  %v5272_v25 = vsub.s32 %v676_v22, %v5269_v15  ;;  %v5281_v46 = vsub.s32 %v722_v42, %v5269_v15  ;;  %v969_v42 = vcombine.high %v4623_v39, %v4623_v39  ;;  %s5077_s26 = smov 80   ;;  %s5078_s28 = smov 72  }
  0x2b   : > { %v660_v19 = vld [vmem:[#allocation2 + $0xc] sm:$0x3]  ;;  %v661_v20 = vld [vmem:[#allocation2 + $0xe] sm:$0x3]  ;;  %v689_v23 = vcombine.low %v658_v16, %v659_v17  ;;  %v743_v45 = vunpack.c.0.s8 %v742_v41  ;;  %v5284_v47 = vsub.s32 %v729_v43, %v5269_v15  ;;  %v5287_v48 = vsub.s32 %v736_v44, %v5269_v15  ;;  %s5079_s29 = smov 120   ;;  %s5080_s13 = smov 112  }
  0x2c   : > { %v690_v24 = vcombine.low %v660_v19, %v661_v20  ;;  %v680_v26 = vrot.slane %v672_v18, %v5272_v25  ;;  %v687_v27 = vrot.slane %v673_v21, %v5272_v25  ;;  %v942_v41 = vrot.slane %v4622_v38, %v5272_v25  ;;  %s5081_s16 = smov 104   ;;  %s5085_s19 = smov 64  }
  0x2d   : > { %v697_v28 = vrot.slane %v689_v23, %v5272_v25  ;;  %v5290_v49 = vsub.s32 %v743_v45, %v5269_v15  ;;  %v949_v43 = vrot.slane %v935_v40, %v5272_v25  ;;  %v976_v44 = vrot.slane %v4623_v39, %v5272_v25  ;;  %s5086_s18 = smov 56   ;;  %s5088_s22 = smov 40  }
  0x2e   : > { %v704_v29 = vrot.slane %v690_v24, %v5272_v25  ;;  %v688_v30 = vcombine.low %v680_v26, %v687_v27  ;;  %vm5083_vm2 = vmmov 0   ;;  %vm2014_vm3 = vcmask 64512   ;;  %p4682_p6 = scmp.ne.s32.totalorder %s5060_s25, 1 }
  0x2f   : > { %vm3593_vm4 = vcmask 130048   ;;  %vm3596_vm5 = vcmask 195584   ;;  %vm4403_vm6 = vcmask 254976  }
  0x30   : > { %v705_v31 = vcombine.low %v697_v28, %v704_v29  ;;  %v709_v32 = vsel %vm708_vm1, %v688_v30, 0.0  ;;  %v1001_v28 = vld [vmem:[%s5206_s15 + $0x18] sm:$0xff]  ;;  %v1000_v29 = vld [vmem:[%s5206_s15 + $0x10] sm:$0xff]  ;;  %v999_v30 = vld [vmem:[%s5206_s15 + $0x8] sm:$0xff] }
  0x31   : > { %710 = vadd.xlane.f32.xlu0 %v709_v32  ;;  %4759 = vmatprep.subr.mxu1 %v1001_v28 }
  0x32   : > { %v712_v33 = vsel %vm708_vm1, %v705_v31, 0.0  ;;  %4760 = vmatpush3.msra.mxu1 %v1001_v28  ;;  %v998_v31 = vld [vmem:[%s5206_s15] sm:$0xff]  ;;  %s5087_s15 = smov 48  }
  0x33   : > { %4761 = vmatprep.subr.mxu1 %v1000_v29 }
  0x34   : > { %4762 = vmatpush3.msra.mxu1 %v1000_v29 }
  0x35   : > { %713 = vadd.xlane.f32.xlu0 %v712_v33  ;;  %4763 = vmatprep.subr.mxu1 %v999_v30 }
  0x36   : > { %4764 = vmatpush3.msra.mxu1 %v999_v30 }
  0x37   : > { %4765 = vmatprep.subr.mxu1 %v998_v31 }
  0x38   : > { %4766 = vmatpush3.msra.mxu1 %v998_v31 }
  0xba   : > { %v711_v50 = vpop.xlane.xlu0 %710 }
  0xbb   : > { %v716_v51 = vmul.f32 0.03125, %v711_v50  ;;  %v950_v50 = vcombine.high %v942_v41, %v942_v41 }
  0xbd   : > { %v726_v52 = vrot.slane %v716_v51, %v5281_v46  ;;  %v733_v53 = vrot.slane %v716_v51, %v5284_v47  ;;  %v740_v54 = vrot.slane %v716_v51, %v5287_v48  ;;  %v747_v55 = vrot.slane %v716_v51, %v5290_v49 }
  0xbe   : > { %v714_v56 = vpop.xlane.xlu0 %713  ;;  %v983_v51 = vrot.slane %v969_v42, %v5272_v25 }
  0xbf   : > { %v717_v57 = vmul.f32 0.03125, %v714_v56  ;;  %v5296_v58 = vsub.f32 %v654_v8, %v726_v52  ;;  %v5298_v59 = vsub.f32 %v655_v9, %v733_v53  ;;  %v5300_v60 = vsub.f32 %v656_v11, %v740_v54 }
  0xc0   : > { %v5302_v61 = vsub.f32 %v657_v12, %v747_v55  ;;  %v951_v56 = vcombine.high %v949_v43, %v949_v43 }
  0xc1   : > { %v754_v62 = vrot.slane %v717_v57, %v5281_v46  ;;  %v761_v63 = vrot.slane %v717_v57, %v5284_v47  ;;  %v768_v0 = vrot.slane %v717_v57, %v5287_v48  ;;  %v775_v1 = vrot.slane %v717_v57, %v5290_v49 }
  0xc2   : > { %v792_v2 = vmul.f32 %v5296_v58, %v5296_v58  ;;  %v793_v3 = vmul.f32 %v5298_v59, %v5298_v59  ;;  %v794_v4 = vmul.f32 %v5300_v60, %v5300_v60  ;;  %v795_v5 = vmul.f32 %v5302_v61, %v5302_v61 }
  0xc3   : > { %v5316_v6 = vsub.f32 %v658_v16, %v754_v62  ;;  %v5318_v7 = vsub.f32 %v659_v17, %v761_v63  ;;  %v5320_v8 = vsub.f32 %v660_v19, %v768_v0  ;;  %v5322_v9 = vsub.f32 %v661_v20, %v775_v1 }
  0xc4   : > { %v808_v10 = vcombine.low %v792_v2, %v793_v3  ;;  %v809_v11 = vcombine.low %v794_v4, %v795_v5  ;;  %v984_v57 = vcombine.high %v976_v44, %v976_v44  ;;  %v985_v3 = vcombine.high %v983_v51, %v983_v51 }
  0xc5   : > { %v796_v12 = vmul.f32 %v5316_v6, %v5316_v6  ;;  %v797_v13 = vmul.f32 %v5318_v7, %v5318_v7  ;;  %v798_v14 = vmul.f32 %v5320_v8, %v5320_v8  ;;  %v799_v16 = vmul.f32 %v5322_v9, %v5322_v9 }
  0xc6   : > { %v816_v17 = vrot.slane %v808_v10, %v5272_v25  ;;  %v823_v18 = vrot.slane %v809_v11, %v5272_v25 }
  0xc7   : > { %v825_v19 = vcombine.low %v796_v12, %v797_v13  ;;  %v826_v20 = vcombine.low %v798_v14, %v799_v16 }
  0xc8   : > { %v824_v21 = vcombine.low %v816_v17, %v823_v18 }
  0xc9   : > { %v833_v22 = vrot.slane %v825_v19, %v5272_v25  ;;  %v840_v23 = vrot.slane %v826_v20, %v5272_v25 }
  0xca   : > { %v844_v24 = vsel %vm708_vm1, %v824_v21, 0.0 }
  0xcb   : > { %845 = vadd.xlane.f32.xlu1 %v844_v24  ;;  %v841_v26 = vcombine.low %v833_v22, %v840_v23 }
  0xcd   : > { %v847_v27 = vsel %vm708_vm1, %v841_v26, 0.0 }
  0xcf   : > { %848 = vadd.xlane.f32.xlu1 %v847_v27 }
 0x154   : > { %v846_v32 = vpop.xlane.xlu1 %845 }
 0x155   : > { %v850_v33 = vmul.f32 0.03125, %v846_v32 }
 0x157   : > { %v852_v34 = vadd.f32 1e-05, %v850_v33 }
 0x158   : > { %v849_v35 = vpop.xlane.xlu1 %848 }
 0x159   : > { %4962 = vrsqrt.f32 %v852_v34  ;;  %v851_v36 = vmul.f32 0.03125, %v849_v35 }
 0x15b   : > { %v853_v37 = vadd.f32 1e-05, %v851_v36  ;;  %v4624_v36 = vld [vmem:[%s5924_s20] ss:$0 sm:$0xff]  ;;  %s5925_s20 = sld [smem:[#allocation9_spill]] }
 0x15d   : > { %4964 = vrsqrt.f32 %v853_v37 }
 0x166   : > { %v4963_v45 = vpop.eup %4962 }
 0x167   : > { %v864_v52 = vrot.slane %v4963_v45, %v5281_v46  ;;  %v871_v53 = vrot.slane %v4963_v45, %v5284_v47  ;;  %v878_v54 = vrot.slane %v4963_v45, %v5287_v48  ;;  %v885_v55 = vrot.slane %v4963_v45, %v5290_v49 }
 0x169   : > { %v922_v62 = vmul.f32 %v864_v52, %v5296_v58  ;;  %v923_v63 = vmul.f32 %v871_v53, %v5298_v59  ;;  %v924_v0 = vmul.f32 %v878_v54, %v5300_v60  ;;  %v925_v1 = vmul.f32 %v885_v55, %v5302_v61 }
 0x16a   : > { %v4965_v2 = vpop.eup %4964 }
 0x16b   : > { %v899_v4 = vrot.slane %v4965_v2, %v5284_v47  ;;  %v913_v5 = vrot.slane %v4965_v2, %v5290_v49  ;;  %v956_v10 = vmul.f32 %v942_v41, %v922_v62  ;;  %v957_v11 = vmul.f32 %v950_v50, %v923_v63 }
 0x16c   : > { %v958_v12 = vmul.f32 %v949_v43, %v924_v0  ;;  %v959_v13 = vmul.f32 %v951_v56, %v925_v1  ;;  %v892_v14 = vrot.slane %v4965_v2, %v5281_v46  ;;  %v906_v58 = vrot.slane %v4965_v2, %v5287_v48 }
 0x16d   : > { %v927_v59 = vmul.f32 %v899_v4, %v5318_v7  ;;  %v929_v60 = vmul.f32 %v913_v5, %v5322_v9  ;;  %v990_v16 = vadd.f32 %v976_v44, %v956_v10  ;;  %v991_v61 = vadd.f32 %v984_v57, %v957_v11 }
 0x16e   : > { %v992_v17 = vadd.f32 %v983_v51, %v958_v12  ;;  %v993_v18 = vadd.f32 %v985_v3, %v959_v13  ;;  %v926_v19 = vmul.f32 %v892_v14, %v5316_v6  ;;  %v928_v20 = vmul.f32 %v906_v58, %v5320_v8 }
 0x16f   : > { %v961_v21 = vmul.f32 %v950_v50, %v927_v59  ;;  %v963_v22 = vmul.f32 %v951_v56, %v929_v60  ;;  %v1017_v23 = vcombine.low %v990_v16, %v991_v61  ;;  %v5084_v50 = vmov 1934713408  }
 0x170   : > { %v1018_v24 = vcombine.low %v992_v17, %v993_v18  ;;  %v960_v26 = vmul.f32 %v942_v41, %v926_v19  ;;  %v962_v27 = vmul.f32 %v949_v43, %v928_v20  ;;  %v5082_v41 = vmov 0.0  }
 0x171   : > { %v995_v28 = vadd.f32 %v984_v57, %v961_v21  ;;  %v997_v29 = vadd.f32 %v985_v3, %v963_v22  ;;  %v1025_v7 = vrot.slane %v1017_v23, %v5272_v25  ;;  %4770 = vmatprep.subr.mxu1 %v5082_v41  ;;  %4780 = vmatprep.subr.mxu0 %v5082_v41 }
 0x172   : > { %v1032_v9 = vrot.slane %v1018_v24, %v5272_v25  ;;  %v994_v30 = vadd.f32 %v976_v44, %v960_v26  ;;  %v996_v31 = vadd.f32 %v983_v51, %v962_v27  ;;  %4782 = vmatprep.mubr.msk.f32.mxu0 %vm5083_vm2, %v5082_v41  ;;  %v1265_v51 = vunpack.c.l.s4 %v5084_v50 }
 0x174   : > { %v1033_v32 = vcombine.low %v1025_v7, %v1032_v9  ;;  %v1034_v33 = vcombine.low %v994_v30, %v995_v28  ;;  %v1035_v6 = vcombine.low %v996_v31, %v997_v29  ;;  %v1266_v54 = vunpack.c.0.s8 %v1265_v51 }
 0x176   : > { %4767 = vmatprep.mubr.msk.f32.mxu1 %vm708_vm1, %v1033_v32  ;;  %v1042_v8 = vrot.slane %v1034_v33, %v5272_v25  ;;  %v1049_v34 = vrot.slane %v1035_v6, %v5272_v25  ;;  %v5408_v0 = vsub.s32 %v1266_v54, %v5269_v15 }
 0x178   : > { %v1050_v35 = vcombine.low %v1042_v8, %v1049_v34 }
 0x17a   : > { %4768 = vmatmul.mubr.msk.f32.vlgmr.msra.gmra.mxu1 %vm708_vm1, %v1050_v35 }
 0x17b   : > { %4772 = vmatprep.mubr.msk.f32.mxu1 %vm5083_vm2, %v5082_v41 }
 0x23a   : > { %v4769_v37 = vpop.f32.mrf.mxu1 }
 0x23b   : > { %v5383_v38 = vadd.f32 %v4769_v37, %v4624_v36 }
 0x23c   : > { %v1121_v39 = vpop.f32.mrf.mxu1 }
 0x23d   : > { %v5385_v40 = vadd.f32 %v4624_v36, %v1121_v39  ;;  %1152 = vrot.lane.b32.xlu1 %v5383_v38, %s5075_s24 }
 0x23f   : > { %1150 = vrot.lane.b32.xlu0 %v5385_v40, %s5075_s24  ;;  %s5089_s24 = smov 8  }
 0x241   : > { %1158 = vrot.lane.b32.xlu1 %v5383_v38, %s5076_s14 }
 0x243   : > { %1162 = vrot.lane.b32.xlu0 %v5385_v40, %s5077_s26 }
 0x245   : > { %1164 = vrot.lane.b32.xlu1 %v5383_v38, %s5077_s26  ;;  %s5091_s26 = smov 24  }
 0x247   : > { %1168 = vrot.lane.b32.xlu0 %v5385_v40, %s5078_s28 }
 0x249   : > { %1170 = vrot.lane.b32.xlu1 %v5383_v38, %s5078_s28 }
 0x24b   : > { %1132 = vrot.lane.b32.xlu0 %v5385_v40, %s5079_s29 }
 0x24d   : > { %1134 = vrot.lane.b32.xlu1 %v5383_v38, %s5079_s29 }
 0x24f   : > { %1138 = vrot.lane.b32.xlu0 %v5385_v40, %s5080_s13 }
 0x251   : > { %1140 = vrot.lane.b32.xlu1 %v5383_v38, %s5080_s13  ;;  %s5926_s13 = scalar_lea.vmem %s5902_s6, %s5188_s30 }
 0x253   : > { %1144 = vrot.lane.b32.xlu0 %v5385_v40, %s5081_s16 }
 0x255   : > { %1156 = vrot.lane.b32.xlu1 %v5385_v40, %s5076_s14  ;;  %s5090_s14 = smov 16  }
 0x259   : > { %1146 = vrot.lane.b32.xlu1 %v5383_v38, %s5081_s16 }
 0x2af   : > { %v1153_v42 = vpop.permute.xlu1 %1152 }
 0x2b1   : > { %v1151_v43 = vpop.permute.xlu0 %1150 }
 0x2b3   : > { %v1159_v44 = vpop.permute.xlu1 %1158 }
 0x2b5   : > { %v1163_v45 = vpop.permute.xlu0 %1162 }
 0x2b6   : > { %v1230_v58 = vcombine.low %v1151_v43, %v1163_v45  ;;  %v1231_v17 = vcombine.high %v1151_v43, %v1163_v45 }
 0x2b7   : > { %v1165_v52 = vpop.permute.xlu1 %1164 }
 0x2b8   : > { %v1434_v55 = vcombine.low %v1153_v42, %v1165_v52  ;;  %v1435_v56 = vcombine.high %v1153_v42, %v1165_v52  ;;  %v1238_v22 = vrot.slane %v1230_v58, %v5272_v25  ;;  %v1245_v26 = vrot.slane %v1231_v17, %v5272_v25 }
 0x2b9   : > { %v1169_v53 = vpop.permute.xlu0 %1168 }
 0x2ba   : > { %v1442_v2 = vrot.slane %v1434_v55, %v5272_v25  ;;  %v1449_v3 = vrot.slane %v1435_v56, %v5272_v25 }
 0x2bb   : > { %v1171_v57 = vpop.permute.xlu1 %1170 }
 0x2bc   : > { %v1450_v62 = vcombine.low %v1159_v44, %v1171_v57  ;;  %v1451_v63 = vcombine.high %v1159_v44, %v1171_v57 }
 0x2bd   : > { %v1133_v1 = vpop.permute.xlu0 %1132 }
 0x2be   : > { %v1458_v4 = vrot.slane %v1450_v62, %v5272_v25  ;;  %v1465_v5 = vrot.slane %v1451_v63, %v5272_v25 }
 0x2bf   : > { %v5414_v10 = vpop.permute.xlu1 %1134 }
 0x2c0   : > { %v1498_v11 = vcombine.low %v1442_v2, %v1458_v4  ;;  %v1499_v12 = vcombine.high %v1442_v2, %v1458_v4  ;;  %v1514_v13 = vcombine.low %v1449_v3, %v1465_v5  ;;  %v1515_v14 = vcombine.high %v1449_v3, %v1465_v5 }
 0x2c1   : > { %v1139_v59 = vpop.permute.xlu0 %1138 }
 0x2c2   : > { %v1506_v15 = vrot.slane %v1498_v11, %v5408_v0  ;;  %v1513_v60 = vrot.slane %v1499_v12, %v5408_v0  ;;  %v1522_v16 = vrot.slane %v1514_v13, %v5408_v0  ;;  %v1529_v61 = vrot.slane %v1515_v14, %v5408_v0 }
 0x2c3   : > { %v1141_v18 = vpop.permute.xlu1 %1140  ;;  %v1198_v19 = vcombine.low %v5385_v40, %v1139_v59  ;;  %v1199_v20 = vcombine.high %v5385_v40, %v1139_v59 }
 0x2c4   : > { %v4632_v23 = vcombine.low %v1506_v15, %v1522_v16  ;;  %v4634_v24 = vcombine.low %v1513_v60, %v1529_v61  ;;  %v4640_v27 = vcombine.high %v1506_v15, %v1522_v16  ;;  %v4642_v9 = vcombine.high %v1513_v60, %v1529_v61 }
 0x2c5   : > { %v1145_v21 = vpop.permute.xlu0 %1144  ;;  %v1206_v30 = vrot.slane %v1198_v19, %v5272_v25  ;;  %v1213_v31 = vrot.slane %v1199_v20, %v5272_v25  ;;  %v1402_v33 = vcombine.low %v5383_v38, %v1141_v18  ;;  %v1403_v37 = vcombine.high %v5383_v38, %v1141_v18 }
 0x2c6   : > { %v1214_v28 = vcombine.low %v1133_v1, %v1145_v21  ;;  %v1215_v29 = vcombine.high %v1133_v1, %v1145_v21  ;;  %v1653_v35 = vrot.slane %v4632_v23, %v5272_v25  ;;  %v1669_v36 = vrot.slane %v4634_v24, %v5272_v25 }
 0x2c7   : > { %v1157_v7 = vpop.permute.xlu1 %1156  ;;  %v5442_v5 = vrot.slane %v4640_v27, %v5272_v25  ;;  %v5448_v59 = vrot.slane %v4642_v9, %v5272_v25  ;;  %v1410_v15 = vrot.slane %v1402_v33, %v5272_v25  ;;  %v1417_v60 = vrot.slane %v1403_v37, %v5272_v25 }
 0x2c8   : > { %v1246_v32 = vcombine.low %v1157_v7, %v1169_v53  ;;  %v1222_v6 = vrot.slane %v1214_v28, %v5272_v25  ;;  %v1229_v8 = vrot.slane %v1215_v29, %v5272_v25  ;;  %v1247_v34 = vcombine.high %v1157_v7, %v1169_v53 }
 0x2c9   : > { %v1718_v4 = vcombine.low %v1653_v35, %v1669_v36 }
 0x2ca   : > { %v1254_v39 = vrot.slane %v1246_v32, %v5272_v25  ;;  %v1262_v42 = vcombine.low %v1206_v30, %v1222_v6  ;;  %v1263_v43 = vcombine.high %v1206_v30, %v1222_v6  ;;  %v1278_v44 = vcombine.low %v1213_v31, %v1229_v8 }
 0x2cb   : > { %v1279_v45 = vcombine.high %v1213_v31, %v1229_v8  ;;  %v1147_v50 = vpop.permute.xlu1 %1146  ;;  %v1261_v51 = vrot.slane %v1247_v34, %v5272_v25 }
 0x2cc   : > { %v1294_v52 = vcombine.low %v1238_v22, %v1254_v39  ;;  %v1295_v54 = vcombine.high %v1238_v22, %v1254_v39  ;;  %v1418_v55 = vcombine.low %v5414_v10, %v1147_v50  ;;  %v1270_v53 = vrot.slane %v1262_v42, %v5408_v0 }
 0x2cd   : > { %v1277_v56 = vrot.slane %v1263_v43, %v5408_v0  ;;  %v1286_v57 = vrot.slane %v1278_v44, %v5408_v0  ;;  %v1293_v62 = vrot.slane %v1279_v45, %v5408_v0  ;;  %v1310_v2 = vcombine.low %v1245_v26, %v1261_v51 }
 0x2ce   : > { %v1302_v63 = vrot.slane %v1294_v52, %v5408_v0  ;;  %v1309_v1 = vrot.slane %v1295_v54, %v5408_v0  ;;  %v1311_v3 = vcombine.high %v1245_v26, %v1261_v51  ;;  %v1419_v58 = vcombine.high %v5414_v10, %v1147_v50 }
 0x2cf   : > { %v4627_v11 = vcombine.low %v1270_v53, %v1286_v57  ;;  %v4629_v12 = vcombine.low %v1277_v56, %v1293_v62  ;;  %v1318_v13 = vrot.slane %v1310_v2, %v5408_v0  ;;  %v1426_v16 = vrot.slane %v1418_v55, %v5272_v25 }
 0x2d0   : > { %v1325_v14 = vrot.slane %v1311_v3, %v5408_v0  ;;  %v4635_v20 = vcombine.high %v1270_v53, %v1286_v57  ;;  %v1433_v21 = vrot.slane %v1419_v58, %v5272_v25  ;;  %v5455_v22 = vrot.slane %v1718_v4, %v5408_v0 }
 0x2d1   : > { %v4628_v61 = vcombine.low %v1302_v63, %v1318_v13  ;;  %v4636_v18 = vcombine.high %v1302_v63, %v1318_v13  ;;  %v1719_v10 = vcombine.high %v1653_v35, %v1669_v36  ;;  %v1614_v23 = vrot.slane %v4627_v11, %v5272_v25 }
 0x2d2   : > { %v4630_v17 = vcombine.low %v1309_v1, %v1325_v14  ;;  %v4638_v19 = vcombine.high %v1309_v1, %v1325_v14  ;;  %v1630_v24 = vrot.slane %v4629_v12, %v5272_v25  ;;  %v1466_v28 = vcombine.low %v1410_v15, %v1426_v16 }
 0x2d3   : > { %v1621_v26 = vrot.slane %v4628_v61, %v5272_v25  ;;  %v1467_v29 = vcombine.high %v1410_v15, %v1426_v16  ;;  %v1482_v7 = vcombine.low %v1417_v60, %v1433_v21  ;;  %v1483_v9 = vcombine.high %v1417_v60, %v1433_v21 }
 0x2d4   : > { %v1637_v27 = vrot.slane %v4630_v17, %v5272_v25  ;;  %v1825_v31 = vrot.slane %v4636_v18, %v5272_v25  ;;  %v1841_v32 = vrot.slane %v4638_v19, %v5272_v25  ;;  %v1474_v6 = vrot.slane %v1466_v28, %v5408_v0 }
 0x2d5   : > { %v1481_v8 = vrot.slane %v1467_v29, %v5408_v0  ;;  %v1490_v34 = vrot.slane %v1482_v7, %v5408_v0  ;;  %v1497_v35 = vrot.slane %v1483_v9, %v5408_v0  ;;  %v4637_v36 = vcombine.high %v1277_v56, %v1293_v62 }
 0x2d6   : > { %v1686_v30 = vcombine.low %v1621_v26, %v1637_v27  ;;  %v1687_v33 = vcombine.high %v1621_v26, %v1637_v27  ;;  %v1733_v42 = vrot.slane %v1719_v10, %v5408_v0  ;;  %v1670_v51 = vcombine.low %v1614_v23, %v1630_v24 }
 0x2d7   : > { %v4631_v43 = vcombine.low %v1474_v6, %v1490_v34  ;;  %v4633_v44 = vcombine.low %v1481_v8, %v1497_v35  ;;  %v4639_v45 = vcombine.high %v1474_v6, %v1490_v34  ;;  %v4641_v50 = vcombine.high %v1481_v8, %v1497_v35 }
 0x2d8   : > { %v1694_v37 = vrot.slane %v1686_v30, %v5408_v0  ;;  %v1701_v39 = vrot.slane %v1687_v33, %v5408_v0  ;;  %v1890_v52 = vcombine.low %v1825_v31, %v1841_v32  ;;  %v1818_v63 = vrot.slane %v4635_v20, %v5272_v25 }
 0x2d9   : > { %v1646_v53 = vrot.slane %v4631_v43, %v5272_v25  ;;  %v1662_v57 = vrot.slane %v4633_v44, %v5272_v25  ;;  %v1850_v56 = vrot.slane %v4639_v45, %v5272_v25  ;;  %v1866_v62 = vrot.slane %v4641_v50, %v5272_v25 }
 0x2da   : > { %v1738_v54 = vcombine.low %v1694_v37, %v5455_v22  ;;  %v1740_v55 = vcombine.low %v1701_v39, %v1733_v42  ;;  %v1834_v1 = vrot.slane %v4637_v36, %v5272_v25  ;;  %v1671_v2 = vcombine.high %v1614_v23, %v1630_v24 }
 0x2db   : > { %v1922_v3 = vcombine.low %v5442_v5, %v5448_v59  ;;  %v1702_v4 = vcombine.low %v1646_v53, %v1662_v57  ;;  %v1906_v11 = vcombine.low %v1850_v56, %v1866_v62  ;;  %v1703_v12 = vcombine.high %v1646_v53, %v1662_v57 }
 0x2dc   : > { %4771 = vmatpush3.xpose.msk.msra.mxu1 %vm2014_vm3, %v1738_v54  ;;  %4781 = vmatpush3.xpose.msk.msra.mxu0 %vm2014_vm3, %v1740_v55  ;;  %v1891_v13 = vcombine.high %v1825_v31, %v1841_v32  ;;  %v1678_v14 = vrot.slane %v1670_v51, %v5408_v0  ;;  %v1898_v15 = vrot.slane %v1890_v52, %v5408_v0 }
 0x2dd   : > { %4775 = vmatprep.subr.mxu1 %v5082_v41  ;;  %4790 = vmatprep.subr.mxu0 %v5082_v41  ;;  %v1710_v58 = vrot.slane %v1702_v4, %v5408_v0  ;;  %v1874_v60 = vcombine.low %v1818_v63, %v1834_v1  ;;  %v1685_v16 = vrot.slane %v1671_v2, %v5408_v0 }
 0x2de   : > { %v1717_v61 = vrot.slane %v1703_v12, %v5408_v0  ;;  %v1923_v17 = vcombine.high %v5442_v5, %v5448_v59  ;;  %v1930_v19 = vrot.slane %v1922_v3, %v5408_v0  ;;  %v1907_v20 = vcombine.high %v1850_v56, %v1866_v62 }
 0x2df   : > { %v1734_v18 = vcombine.low %v1678_v14, %v1710_v58  ;;  %v1739_v21 = vcombine.high %v1694_v37, %v5455_v22  ;;  %v1914_v23 = vrot.slane %v1906_v11, %v5408_v0  ;;  %v1905_v26 = vrot.slane %v1891_v13, %v5408_v0 }
 0x2e0   : > { %v1736_v10 = vcombine.low %v1685_v16, %v1717_v61  ;;  %v1942_v24 = vcombine.low %v1898_v15, %v1930_v19  ;;  %v1875_v27 = vcombine.high %v1818_v63, %v1834_v1  ;;  %v1882_v5 = vrot.slane %v1874_v60, %v5408_v0 }
 0x2e1   : > { %4773 = vmatmul.mubr.msk.f32.vlgmr.msra.gmra.mxu1 %vm2014_vm3, %v1734_v18  ;;  %v1735_v59 = vcombine.high %v1678_v14, %v1710_v58  ;;  %v1937_v22 = vrot.slane %v1923_v17, %v5408_v0  ;;  %v1741_v28 = vcombine.high %v1701_v39, %v1733_v42  ;;  %v1921_v7 = vrot.slane %v1907_v20, %v5408_v0 }
 0x2e2   : > { %4776 = vmatpush3.xpose.msk.msra.mxu1 %vm2014_vm3, %v1739_v21  ;;  %4783 = vmatmul.mubr.msk.f32.vlgmr.msra.gmra.mxu0 %vm2014_vm3, %v1736_v10  ;;  %v1938_v29 = vcombine.low %v1882_v5, %v1914_v23  ;;  %v1889_v30 = vrot.slane %v1875_v27, %v5408_v0  ;;  %v1737_v31 = vcombine.high %v1685_v16, %v1717_v61 }
 0x2e3   : > { %4791 = vmatpush3.xpose.msk.msra.mxu0 %vm2014_vm3, %v1942_v24  ;;  %4777 = vmatprep.mubr.msk.f32.mxu1 %vm5083_vm2, %v5082_v41  ;;  %v1944_v9 = vcombine.low %v1905_v26, %v1937_v22  ;;  %v1943_v32 = vcombine.high %v1898_v15, %v1930_v19  ;;  %v1939_v6 = vcombine.high %v1882_v5, %v1914_v23 }
 0x2e4   : > { %4785 = vmatprep.subr.mxu1 %v5082_v41  ;;  %4792 = vmatprep.mubr.msk.f32.mxu0 %vm5083_vm2, %v5082_v41  ;;  %v1940_v33 = vcombine.low %v1889_v30, %v1921_v7  ;;  %v1945_v8 = vcombine.high %v1905_v26, %v1937_v22  ;;  %v1941_v34 = vcombine.high %v1889_v30, %v1921_v7 }
 0x2e5   : > { %4800 = vmatprep.subr.mxu0 %v5082_v41  ;;  %4778 = vmatmul.mubr.msk.f32.vlgmr.msra.gmra.mxu1 %vm2014_vm3, %v1735_v59 }
 0x2e6   : > { %4786 = vmatpush3.xpose.msk.msra.mxu1 %vm2014_vm3, %v1741_v28  ;;  %4793 = vmatmul.mubr.msk.f32.vlgmr.msra.gmra.mxu0 %vm2014_vm3, %v1938_v29 }
 0x2e7   : > { %4801 = vmatpush3.xpose.msk.msra.mxu0 %vm2014_vm3, %v1944_v9  ;;  %4787 = vmatprep.mubr.msk.f32.mxu1 %vm5083_vm2, %v5082_v41 }
 0x2e8   : > { %4795 = vmatprep.subr.mxu1 %v5082_v41  ;;  %4802 = vmatprep.mubr.msk.f32.mxu0 %vm5083_vm2, %v5082_v41 }
 0x2e9   : > { %4788 = vmatmul.mubr.msk.f32.vlgmr.msra.gmra.mxu1 %vm2014_vm3, %v1737_v31  ;;  %4810 = vmatprep.subr.mxu0 %v5082_v41 }
 0x2ea   : > { %4796 = vmatpush3.xpose.msk.msra.mxu1 %vm2014_vm3, %v1943_v32  ;;  %4803 = vmatmul.mubr.msk.f32.vlgmr.msra.gmra.mxu0 %vm2014_vm3, %v1940_v33 }
 0x2eb   : > { %4797 = vmatprep.mubr.msk.f32.mxu1 %vm5083_vm2, %v5082_v41  ;;  %4805 = vmatprep.subr.mxu1 %v5082_v41 }
 0x2ec   : > { %4812 = vmatprep.mubr.msk.f32.mxu0 %vm5083_vm2, %v5082_v41 }
 0x2ed   : > { %4798 = vmatmul.mubr.msk.f32.vlgmr.msra.gmra.mxu1 %vm2014_vm3, %v1939_v6 }
 0x2ee   : > { %4806 = vmatpush3.xpose.msk.msra.mxu1 %vm2014_vm3, %v1945_v8  ;;  %4807 = vmatprep.mubr.msk.f32.mxu1 %vm5083_vm2, %v5082_v41 }
 0x2ef   : > { %4815 = vmatprep.subr.mxu1 %v5082_v41 }
 0x2f1   : > { %4808 = vmatmul.mubr.msk.f32.vlgmr.msra.gmra.mxu1 %vm2014_vm3, %v1941_v34 }
 0x2f2   : > { %4817 = vmatprep.mubr.msk.f32.mxu1 %vm5083_vm2, %v5082_v41 }
 0x3a1   : > { %v2087_v35 = vpop.f32.mrf.mxu1 }
 0x3a2   : > { %v2239_v36 = vpop.f32.mrf.mxu0  ;;  %v2623_v37 = vsel %vm2014_vm3, %v2087_v35, -inf }
 0x3a3   : > { %2624 = vmax.xlane.f32.xlu0 %v2623_v37  ;;  %v4774_v39 = vpop.f32.mrf.mxu1  ;;  %v2629_v45 = vsel %vm2014_vm3, %v2239_v36, -inf }
 0x3a4   : > { %v4784_v42 = vpop.f32.mrf.mxu0 }
 0x3a5   : > { %v2163_v43 = vpop.f32.mrf.mxu1 }
 0x3a6   : > { %v2391_v44 = vpop.f32.mrf.mxu0  ;;  %v2626_v50 = vsel %vm2014_vm3, %v2163_v43, -inf }
 0x3a7   : > { %2630 = vmax.xlane.f32.xlu0 %v2629_v45  ;;  %2627 = vmax.xlane.f32.xlu1 %v2626_v50  ;;  %v4779_v51 = vpop.f32.mrf.mxu1  ;;  %v2635_v63 = vsel %vm2014_vm3, %v2391_v44, -inf }
 0x3a8   : > { %v4794_v52 = vpop.f32.mrf.mxu0 }
 0x3a9   : > { %v2315_v54 = vpop.f32.mrf.mxu1 }
 0x3aa   : > { %v2543_v55 = vpop.f32.mrf.mxu0  ;;  %v2632_v53 = vsel %vm2014_vm3, %v2315_v54, -inf }
 0x3ab   : > { %2633 = vmax.xlane.f32.xlu0 %v2632_v53  ;;  %v4789_v57 = vpop.f32.mrf.mxu1  ;;  %v2641_v4 = vsel %vm2014_vm3, %v2543_v55, -inf }
 0x3ac   : > { %v4804_v56 = vpop.f32.mrf.mxu0 }
 0x3ad   : > { %v2467_v62 = vpop.f32.mrf.mxu1 }
 0x3ae   : > { %v2638_v1 = vsel %vm2014_vm3, %v2467_v62, -inf }
 0x3af   : > { %2636 = vmax.xlane.f32.xlu0 %v2635_v63  ;;  %2639 = vmax.xlane.f32.xlu1 %v2638_v1  ;;  %v4799_v2 = vpop.f32.mrf.mxu1 }
 0x3b1   : > { %v2619_v3 = vpop.f32.mrf.mxu1 }
 0x3b2   : > { %v2644_v11 = vsel %vm2014_vm3, %v2619_v3, -inf }
 0x3b3   : > { %2642 = vmax.xlane.f32.xlu0 %v2641_v4  ;;  %2645 = vmax.xlane.f32.xlu1 %v2644_v11  ;;  %v4809_v12 = vpop.f32.mrf.mxu1 }
 0x3c4   : > { %1176 = vrot.lane.b32.xlu1 %v5383_v38, %s5085_s19 }
 0x3c8   : > { %1180 = vrot.lane.b32.xlu1 %v5385_v40, %s5086_s18 }
 0x3c9   : > { %1174 = vrot.lane.b32.xlu0 %v5385_v40, %s5085_s19 }
 0x3cc   : > { %1182 = vrot.lane.b32.xlu1 %v5383_v38, %s5086_s18 }
 0x3cd   : > { %1186 = vrot.lane.b32.xlu0 %v5385_v40, %s5087_s15 }
 0x3d0   : > { %1188 = vrot.lane.b32.xlu1 %v5383_v38, %s5087_s15 }
 0x3d1   : > { %1192 = vrot.lane.b32.xlu0 %v5385_v40, %s5088_s22 }
 0x3d4   : > { %1194 = vrot.lane.b32.xlu1 %v5383_v38, %s5088_s22 }
 0x42c   : > { %v2625_v13 = vpop.xlane.xlu0 %2624 }
 0x42d   : > { %v2647_v14 = vsub.f32 %v2087_v35, %v2625_v13 }
 0x42f   : > { %v2655_v58 = vmul.f32 1.442695, %v2647_v14 }
 0x430   : > { %v2631_v15 = vpop.xlane.xlu0 %2630  ;;  %v2628_v60 = vpop.xlane.xlu1 %2627 }
 0x431   : > { %4966 = vpow2.f32 %v2655_v58  ;;  %v2649_v16 = vsub.f32 %v2239_v36, %v2631_v15  ;;  %v2648_v61 = vsub.f32 %v2163_v43, %v2628_v60 }
 0x433   : > { %v2659_v17 = vmul.f32 1.442695, %v2649_v16  ;;  %v2657_v18 = vmul.f32 1.442695, %v2648_v61 }
 0x434   : > { %v2634_v19 = vpop.xlane.xlu0 %2633 }
 0x435   : > { %4968 = vpow2.f32 %v2659_v17  ;;  %v2650_v20 = vsub.f32 %v2315_v54, %v2634_v19 }
 0x436   : > { %4970 = vpow2.f32 %v2657_v18 }
 0x437   : > { %v2661_v21 = vmul.f32 1.442695, %v2650_v20 }
 0x438   : > { %v2637_v10 = vpop.xlane.xlu0 %2636  ;;  %v2640_v23 = vpop.xlane.xlu1 %2639 }
 0x439   : > { %4972 = vpow2.f32 %v2661_v21  ;;  %v2651_v40 = vsub.f32 %v2391_v44, %v2637_v10  ;;  %v2652_v38 = vsub.f32 %v2467_v62, %v2640_v23 }
 0x43b   : > { %v2663_v24 = vmul.f32 1.442695, %v2651_v40  ;;  %v2665_v26 = vmul.f32 1.442695, %v2652_v38 }
 0x43c   : > { %v2643_v27 = vpop.xlane.xlu0 %2642  ;;  %v2646_v5 = vpop.xlane.xlu1 %2645 }
 0x43d   : > { %4974 = vpow2.f32 %v2663_v24  ;;  %v2653_v59 = vsub.f32 %v2543_v55, %v2643_v27  ;;  %v2654_v22 = vsub.f32 %v2619_v3, %v2646_v5 }
 0x43e   : > { %v5550_v28 = vpop.eup %4966  ;;  %4976 = vpow2.f32 %v2665_v26 }
 0x43f   : > { %v2667_v29 = vmul.f32 1.442695, %v2653_v59  ;;  %v2669_v7 = vmul.f32 1.442695, %v2654_v22  ;;  %v2671_v9 = vsel %vm2014_vm3, %v5550_v28, 0.0 }
 0x440   : > { %2672 = vadd.xlane.f32.xlu0 %v2671_v9  ;;  %v1175_v30 = vpop.permute.xlu0 %1174  ;;  %v1177_v31 = vpop.permute.xlu1 %1176 }
 0x441   : > { %4978 = vpow2.f32 %v2667_v29 }
 0x442   : > { %v5554_v32 = vpop.eup %4968  ;;  %4980 = vpow2.f32 %v2669_v7 }
 0x443   : > { %v5556_v33 = vpop.eup %4970  ;;  %v2677_v6 = vsel %vm2014_vm3, %v5554_v32, 0.0 }
 0x444   : > { %2678 = vadd.xlane.f32.xlu0 %v2677_v6  ;;  %v1187_v8 = vpop.permute.xlu0 %1186  ;;  %v2674_v34 = vsel %vm2014_vm3, %v5556_v33, 0.0  ;;  %v1181_v35 = vpop.permute.xlu1 %1180 }
 0x445   : > { %2675 = vadd.xlane.f32.xlu1 %v2674_v34  ;;  %v1334_v37 = vcombine.low %v1175_v30, %v1187_v8  ;;  %v1335_v39 = vcombine.high %v1175_v30, %v1187_v8 }
 0x446   : > { %v5562_v36 = vpop.eup %4972 }
 0x447   : > { %v2680_v42 = vsel %vm2014_vm3, %v5562_v36, 0.0  ;;  %v1342_v52 = vrot.slane %v1334_v37, %v5272_v25  ;;  %v1349_v55 = vrot.slane %v1335_v39, %v5272_v25 }
 0x448   : > { %v1193_v43 = vpop.permute.xlu0 %1192  ;;  %v1183_v44 = vpop.permute.xlu1 %1182 }
 0x449   : > { %v1350_v45 = vcombine.low %v1181_v35, %v1193_v43  ;;  %v1351_v50 = vcombine.high %v1181_v35, %v1193_v43  ;;  %2681 = vadd.xlane.f32.xlu1 %v2680_v42 }
 0x44a   : > { %v5566_v51 = vpop.eup %4974 }
 0x44b   : > { %v5569_v54 = vpop.eup %4976  ;;  %v1358_v53 = vrot.slane %v1350_v45, %v5272_v25  ;;  %v1365_v57 = vrot.slane %v1351_v50, %v5272_v25  ;;  %v2683_v56 = vsel %vm2014_vm3, %v5566_v51, 0.0 }
 0x44c   : > { %2684 = vadd.xlane.f32.xlu0 %v2683_v56  ;;  %v2686_v62 = vsel %vm2014_vm3, %v5569_v54, 0.0  ;;  %v1189_v63 = vpop.permute.xlu1 %1188 }
 0x44d   : > { %v1366_v1 = vcombine.low %v1342_v52, %v1358_v53  ;;  %v1367_v2 = vcombine.high %v1342_v52, %v1358_v53  ;;  %v1382_v3 = vcombine.low %v1349_v55, %v1365_v57  ;;  %v1383_v4 = vcombine.high %v1349_v55, %v1365_v57  ;;  %2687 = vadd.xlane.f32.xlu1 %v2686_v62 }
 0x44e   : > { %v5578_v11 = vpop.eup %4978  ;;  %v1538_v60 = vcombine.low %v1177_v31, %v1189_v63  ;;  %v1539_v16 = vcombine.high %v1177_v31, %v1189_v63 }
 0x44f   : > { %v5580_v12 = vpop.eup %4980  ;;  %v1374_v13 = vrot.slane %v1366_v1, %v5408_v0  ;;  %v1381_v14 = vrot.slane %v1367_v2, %v5408_v0  ;;  %v1390_v58 = vrot.slane %v1382_v3, %v5408_v0  ;;  %v1397_v15 = vrot.slane %v1383_v4, %v5408_v0 }
 0x450   : > { %v2689_v61 = vsel %vm2014_vm3, %v5578_v11, 0.0  ;;  %v2692_v17 = vsel %vm2014_vm3, %v5580_v12, 0.0  ;;  %v1195_v18 = vpop.permute.xlu1 %1194  ;;  %v1546_v5 = vrot.slane %v1538_v60, %v5272_v25  ;;  %v1553_v59 = vrot.slane %v1539_v16, %v5272_v25 }
 0x451   : > { %v1742_v19 = vcombine.low %v1374_v13, %v1390_v58  ;;  %v1750_v20 = vcombine.low %v1381_v14, %v1397_v15  ;;  %v4643_v21 = vcombine.high %v1374_v13, %v1390_v58  ;;  %v4644_v10 = vcombine.high %v1381_v14, %v1397_v15  ;;  %2690 = vadd.xlane.f32.xlu0 %v2689_v61 }
 0x452   : > { %2693 = vadd.xlane.f32.xlu1 %v2692_v17  ;;  %v1554_v23 = vcombine.low %v1183_v44, %v1195_v18  ;;  %v1555_v40 = vcombine.high %v1183_v44, %v1195_v18 }
 0x453   : > { %v1749_v38 = vrot.slane %v1742_v19, %v5272_v25  ;;  %v1757_v24 = vrot.slane %v1750_v20, %v5272_v25  ;;  %v1953_v26 = vrot.slane %v4643_v21, %v5272_v25  ;;  %v1961_v27 = vrot.slane %v4644_v10, %v5272_v25 }
 0x454   : > { %v1562_v22 = vrot.slane %v1554_v23, %v5272_v25  ;;  %v1569_v29 = vrot.slane %v1555_v40, %v5272_v25 }
 0x455   : > { %v1775_v7 = vcombine.high %v1749_v38, %v1757_v24  ;;  %v1978_v9 = vcombine.low %v1953_v26, %v1961_v27  ;;  %v1979_v30 = vcombine.high %v1953_v26, %v1961_v27  ;;  %v1774_v52 = vcombine.low %v1749_v38, %v1757_v24 }
 0x456   : > { %v1570_v31 = vcombine.low %v1546_v5, %v1562_v22  ;;  %v1571_v6 = vcombine.high %v1546_v5, %v1562_v22  ;;  %v1586_v8 = vcombine.low %v1553_v59, %v1569_v29  ;;  %v1587_v34 = vcombine.high %v1553_v59, %v1569_v29 }
 0x457   : > { %v1782_v3 = vrot.slane %v1774_v52, %v5408_v0  ;;  %v1789_v4 = vrot.slane %v1775_v7, %v5408_v0  ;;  %v1986_v60 = vrot.slane %v1978_v9, %v5408_v0  ;;  %v1993_v16 = vrot.slane %v1979_v30, %v5408_v0 }
 0x458   : > { %v1578_v35 = vrot.slane %v1570_v31, %v5408_v0  ;;  %v1585_v37 = vrot.slane %v1571_v6, %v5408_v0  ;;  %v1594_v39 = vrot.slane %v1586_v8, %v5408_v0  ;;  %v1601_v42 = vrot.slane %v1587_v34, %v5408_v0 }
 0x45a   : > { %v1758_v43 = vcombine.low %v1578_v35, %v1594_v39  ;;  %v1766_v44 = vcombine.low %v1585_v37, %v1601_v42  ;;  %v4645_v45 = vcombine.high %v1578_v35, %v1594_v39  ;;  %v4646_v50 = vcombine.high %v1585_v37, %v1601_v42 }
 0x45c   : > { %v1765_v55 = vrot.slane %v1758_v43, %v5272_v25  ;;  %v1773_v53 = vrot.slane %v1766_v44, %v5272_v25  ;;  %v1969_v57 = vrot.slane %v4645_v45, %v5272_v25  ;;  %v1977_v56 = vrot.slane %v4646_v50, %v5272_v25 }
 0x45e   : > { %v1790_v62 = vcombine.low %v1765_v55, %v1773_v53  ;;  %v1791_v63 = vcombine.high %v1765_v55, %v1773_v53  ;;  %v1994_v1 = vcombine.low %v1969_v57, %v1977_v56  ;;  %v1995_v2 = vcombine.high %v1969_v57, %v1977_v56 }
 0x460   : > { %v1798_v13 = vrot.slane %v1790_v62, %v5408_v0  ;;  %v1805_v14 = vrot.slane %v1791_v63, %v5408_v0  ;;  %v2002_v58 = vrot.slane %v1994_v1, %v5408_v0  ;;  %v5612_v15 = vrot.slane %v1995_v2, %v5408_v0 }
 0x462   : > { %v1806_v61 = vcombine.low %v1782_v3, %v1798_v13  ;;  %v1807_v17 = vcombine.high %v1782_v3, %v1798_v13  ;;  %v1808_v18 = vcombine.low %v1789_v4, %v1805_v14  ;;  %v1809_v19 = vcombine.high %v1789_v4, %v1805_v14 }
 0x463   : > { %v2010_v20 = vcombine.low %v1986_v60, %v2002_v58  ;;  %v2011_v21 = vcombine.high %v1986_v60, %v2002_v58  ;;  %v2012_v10 = vcombine.low %v1993_v16, %v5612_v15  ;;  %v2013_v23 = vcombine.high %v1993_v16, %v5612_v15 }
 0x464   : > { %4811 = vmatpush3.msra.mxu0 %v1806_v61  ;;  %4816 = vmatpush3.msra.mxu1 %v1807_v17 }
 0x465   : > { %4820 = vmatprep.subr.mxu0 %v5082_v41  ;;  %4825 = vmatprep.subr.mxu1 %v5082_v41 }
 0x4c9   : > { %v2673_v40 = vpop.xlane.xlu0 %2672 }
 0x4ca   : > { %4982 = vrcp.f32 %v2673_v40 }
 0x4cd   : > { %v2679_v38 = vpop.xlane.xlu0 %2678 }
 0x4ce   : > { %4984 = vrcp.f32 %v2679_v38  ;;  %v2676_v24 = vpop.xlane.xlu1 %2675 }
 0x4cf   : > { %4986 = vrcp.f32 %v2676_v24 }
 0x4d2   : > { %v2682_v26 = vpop.xlane.xlu1 %2681 }
 0x4d3   : > { %4988 = vrcp.f32 %v2682_v26 }
 0x4d5   : > { %v2685_v27 = vpop.xlane.xlu0 %2684 }
 0x4d6   : > { %4990 = vrcp.f32 %v2685_v27  ;;  %v2688_v5 = vpop.xlane.xlu1 %2687 }
 0x4d7   : > { %v4983_v59 = vpop.eup %4982  ;;  %4992 = vrcp.f32 %v2688_v5 }
 0x4d8   : > { %v2703_v22 = vmul.f32 %v4983_v59, %v5550_v28 }
 0x4da   : > { %v2691_v29 = vpop.xlane.xlu0 %2690  ;;  %4813 = vmatmul.mubr.msk.f32.vlgmr.msra.gmra.mxu0 %vm2014_vm3, %v2703_v22 }
 0x4db   : > { %v4985_v7 = vpop.eup %4984  ;;  %4994 = vrcp.f32 %v2691_v29  ;;  %v2694_v9 = vpop.xlane.xlu1 %2693  ;;  %4821 = vmatpush3.msra.mxu0 %v1808_v18  ;;  %4822 = vmatprep.mubr.msk.f32.mxu0 %vm5083_vm2, %v5082_v41 }
 0x4dc   : > { %v4987_v30 = vpop.eup %4986  ;;  %4996 = vrcp.f32 %v2694_v9  ;;  %4830 = vmatprep.subr.mxu0 %v5082_v41  ;;  %v2705_v31 = vmul.f32 %v4985_v7, %v5554_v32 }
 0x4dd   : > { %v2704_v6 = vmul.f32 %v4987_v30, %v5556_v33 }
 0x4de   : > { %4823 = vmatmul.mubr.msk.f32.vlgmr.msra.gmra.mxu0 %vm2014_vm3, %v2705_v31 }
 0x4df   : > { %4818 = vmatmul.mubr.msk.f32.vlgmr.msra.gmra.mxu1 %vm2014_vm3, %v2704_v6  ;;  %4831 = vmatpush3.msra.mxu0 %v2010_v20 }
 0x4e0   : > { %v4989_v28 = vpop.eup %4988  ;;  %4826 = vmatpush3.msra.mxu1 %v1809_v19  ;;  %4827 = vmatprep.mubr.msk.f32.mxu1 %vm5083_vm2, %v5082_v41 }
 0x4e1   : > { %4835 = vmatprep.subr.mxu1 %v5082_v41  ;;  %v2706_v8 = vmul.f32 %v4989_v28, %v5562_v36  ;;  %4832 = vmatprep.mubr.msk.f32.mxu0 %vm5083_vm2, %v5082_v41 }
 0x4e2   : > { %4840 = vmatprep.subr.mxu0 %v5082_v41 }
 0x4e3   : > { %v4991_v32 = vpop.eup %4990  ;;  %4828 = vmatmul.mubr.msk.f32.vlgmr.msra.gmra.mxu1 %vm2014_vm3, %v2706_v8 }
 0x4e4   : > { %v4993_v33 = vpop.eup %4992  ;;  %4836 = vmatpush3.msra.mxu1 %v2011_v21  ;;  %4837 = vmatprep.mubr.msk.f32.mxu1 %vm5083_vm2, %v5082_v41  ;;  %v2707_v34 = vmul.f32 %v4991_v32, %v5566_v51 }
 0x4e5   : > { %4845 = vmatprep.subr.mxu1 %v5082_v41  ;;  %v2708_v35 = vmul.f32 %v4993_v33, %v5569_v54 }
 0x4e6   : > { %4833 = vmatmul.mubr.msk.f32.vlgmr.msra.gmra.mxu0 %vm2014_vm3, %v2707_v34 }
 0x4e7   : > { %4838 = vmatmul.mubr.msk.f32.vlgmr.msra.gmra.mxu1 %vm2014_vm3, %v2708_v35  ;;  %4841 = vmatpush3.msra.mxu0 %v2012_v10 }
 0x4e8   : > { %v4995_v36 = vpop.eup %4994  ;;  %4846 = vmatpush3.msra.mxu1 %v2013_v23  ;;  %4842 = vmatprep.mubr.msk.f32.mxu0 %vm5083_vm2, %v5082_v41 }
 0x4e9   : > { %v4997_v37 = vpop.eup %4996  ;;  %4847 = vmatprep.mubr.msk.f32.mxu1 %vm5083_vm2, %v5082_v41  ;;  %v2709_v51 = vmul.f32 %v4995_v36, %v5578_v11 }
 0x4ea   : > { %v2710_v39 = vmul.f32 %v4997_v37, %v5580_v12 }
 0x4eb   : > { %4843 = vmatmul.mubr.msk.f32.vlgmr.msra.gmra.mxu0 %vm2014_vm3, %v2709_v51 }
 0x4ec   : > { %4848 = vmatmul.mubr.msk.f32.vlgmr.msra.gmra.mxu1 %vm2014_vm3, %v2710_v39  ;;  %v3602_v39 = vld [vmem:[%s5925_s20 + $0x18] sm:$0xff] }
 0x4ed   : > { %4850 = vmatprep.subr.mxu1 %v3602_v39 }
 0x4ee   : > { %4851 = vmatpush3.msra.mxu1 %v3602_v39 }
 0x59a   : > { %v2780_v54 = vpop.f32.mrf.mxu0 }
 0x59c   : > { %v4814_v42 = vpop.f32.mrf.mxu0 }
 0x59e   : > { %v2926_v43 = vpop.f32.mrf.mxu0 }
 0x59f   : > { %v2853_v44 = vpop.f32.mrf.mxu1  ;;  %v3295_v52 = vcombine.low %v2780_v54, %v2926_v43  ;;  %v3296_v55 = vcombine.high %v2780_v54, %v2926_v43 }
 0x5a0   : > { %v4824_v45 = vpop.f32.mrf.mxu0 }
 0x5a1   : > { %v4819_v50 = vpop.f32.mrf.mxu1  ;;  %v3303_v11 = vrot.slane %v3295_v52, %v5272_v25  ;;  %v3310_v12 = vrot.slane %v3296_v55, %v5272_v25 }
 0x5a3   : > { %v2999_v53 = vpop.f32.mrf.mxu1 }
 0x5a4   : > { %v3311_v57 = vcombine.low %v2853_v44, %v2999_v53  ;;  %v3312_v56 = vcombine.high %v2853_v44, %v2999_v53 }
 0x5a5   : > { %v4829_v62 = vpop.f32.mrf.mxu1 }
 0x5a6   : > { %v3319_v63 = vrot.slane %v3311_v57, %v5272_v25  ;;  %v3326_v1 = vrot.slane %v3312_v56, %v5272_v25  ;;  %v3072_v2 = vpop.f32.mrf.mxu0 }
 0x5a7   : > { %v3145_v3 = vpop.f32.mrf.mxu1 }
 0x5a8   : > { %v3327_v4 = vcombine.low %v3303_v11, %v3319_v63  ;;  %v3328_v13 = vcombine.high %v3303_v11, %v3319_v63  ;;  %v3343_v14 = vcombine.low %v3310_v12, %v3326_v1  ;;  %v3344_v58 = vcombine.high %v3310_v12, %v3326_v1  ;;  %v4834_v15 = vpop.f32.mrf.mxu0  ;;  %v3601_v11 = vld [vmem:[%s5925_s20 + $0x10] sm:$0xff]  ;;  %v3600_v12 = vld [vmem:[%s5925_s20 + $0x8] sm:$0xff] }
 0x5a9   : > { %v4839_v60 = vpop.f32.mrf.mxu1  ;;  %4852 = vmatprep.subr.mxu1 %v3601_v11 }
 0x5aa   : > { %v3335_v61 = vrot.slane %v3327_v4, %v5408_v0  ;;  %v3342_v17 = vrot.slane %v3328_v13, %v5408_v0  ;;  %v3351_v18 = vrot.slane %v3343_v14, %v5408_v0  ;;  %v3358_v19 = vrot.slane %v3344_v58, %v5408_v0  ;;  %4853 = vmatpush3.msra.mxu1 %v3601_v11 }
 0x5ab   : > { %v3218_v16 = vpop.f32.mrf.mxu0  ;;  %4854 = vmatprep.subr.mxu1 %v3600_v12 }
 0x5ac   : > { %v3291_v20 = vpop.f32.mrf.mxu1  ;;  %v3363_v21 = vcombine.low %v3072_v2, %v3218_v16  ;;  %v3364_v10 = vcombine.high %v3072_v2, %v3218_v16  ;;  %v3359_v22 = vcombine.high %v3335_v61, %v5082_v41  ;;  %v3360_v29 = vcombine.high %v3342_v17, %v5082_v41  ;;  %4855 = vmatpush3.msra.mxu1 %v3600_v12 }
 0x5ad   : > { %v3379_v23 = vcombine.low %v3145_v3, %v3291_v20  ;;  %v3380_v40 = vcombine.high %v3145_v3, %v3291_v20  ;;  %v4844_v38 = vpop.f32.mrf.mxu0  ;;  %v3361_v7 = vcombine.high %v3351_v18, %v5082_v41  ;;  %v3362_v9 = vcombine.high %v3358_v19, %v5082_v41 }
 0x5ae   : > { %v4849_v24 = vpop.f32.mrf.mxu1  ;;  %v3371_v26 = vrot.slane %v3363_v21, %v5272_v25  ;;  %v3378_v27 = vrot.slane %v3364_v10, %v5272_v25  ;;  %v3431_v35 = vcombine.low %v3335_v61, %v3359_v22  ;;  %v3447_v36 = vcombine.low %v3342_v17, %v3360_v29  ;;  %v3599_v61 = vld [vmem:[%s5925_s20] sm:$0xff] }
 0x5af   : > { %v3387_v5 = vrot.slane %v3379_v23, %v5272_v25  ;;  %v3394_v59 = vrot.slane %v3380_v40, %v5272_v25  ;;  %v3499_v37 = vcombine.low %v3351_v18, %v3361_v7  ;;  %v3515_v51 = vcombine.low %v3358_v19, %v3362_v9  ;;  %4856 = vmatprep.subr.mxu1 %v3599_v61 }
 0x5b0   : > { %v3438_v56 = vrot.slane %v3431_v35, %v5272_v25  ;;  %v3454_v62 = vrot.slane %v3447_v36, %v5272_v25  ;;  %4857 = vmatpush3.msra.mxu1 %v3599_v61  ;;  %v4671_v36 = vld [vmem:[%s5926_s13] ss:$0 sm:$0xff]  ;;  %v5017_v61 = vld [vmem:[#allocation2 + $0x6] sm:$0x3] }
 0x5b1   : > { %v3395_v30 = vcombine.low %v3371_v26, %v3387_v5  ;;  %v3396_v31 = vcombine.high %v3371_v26, %v3387_v5  ;;  %v3411_v6 = vcombine.low %v3378_v27, %v3394_v59  ;;  %v3412_v28 = vcombine.high %v3378_v27, %v3394_v59 }
 0x5b2   : > { %v3506_v53 = vrot.slane %v3499_v37, %v5272_v25  ;;  %v3522_v57 = vrot.slane %v3515_v51, %v5272_v25 }
 0x5b3   : > { %v3403_v8 = vrot.slane %v3395_v30, %v5408_v0  ;;  %v3410_v32 = vrot.slane %v3396_v31, %v5408_v0  ;;  %v3419_v33 = vrot.slane %v3411_v6, %v5408_v0  ;;  %v3426_v34 = vrot.slane %v3412_v28, %v5408_v0 }
 0x5b5   : > { %v3427_v54 = vcombine.high %v3403_v8, %v5082_v41  ;;  %v3428_v42 = vcombine.high %v3410_v32, %v5082_v41  ;;  %v3429_v43 = vcombine.high %v3419_v33, %v5082_v41  ;;  %v3430_v44 = vcombine.high %v3426_v34, %v5082_v41 }
 0x5b7   : > { %v3439_v45 = vcombine.low %v3403_v8, %v3427_v54  ;;  %v3455_v50 = vcombine.low %v3410_v32, %v3428_v42  ;;  %v3507_v52 = vcombine.low %v3419_v33, %v3429_v43  ;;  %v3523_v55 = vcombine.low %v3426_v34, %v3430_v44 }
 0x5b9   : > { %v3514_v63 = vrot.slane %v3507_v52, %v5272_v25  ;;  %v3530_v41 = vrot.slane %v3523_v55, %v5272_v25  ;;  %v3446_v1 = vrot.slane %v3439_v45, %v5272_v25  ;;  %v3462_v2 = vrot.slane %v3455_v50, %v5272_v25 }
 0x5bb   : > { %v3531_v3 = vcombine.low %v3506_v53, %v3514_v63  ;;  %v3547_v4 = vcombine.low %v3522_v57, %v3530_v41  ;;  %v3463_v13 = vcombine.low %v3438_v56, %v3446_v1  ;;  %v3479_v14 = vcombine.low %v3454_v62, %v3462_v2 }
 0x5bc   : > { %v3532_v58 = vcombine.high %v3506_v53, %v3514_v63  ;;  %v3548_v15 = vcombine.high %v3522_v57, %v3530_v41  ;;  %v3464_v60 = vcombine.high %v3438_v56, %v3446_v1  ;;  %v3480_v16 = vcombine.high %v3454_v62, %v3462_v2  ;;  %v5010_v53 = vld [vmem:[#allocation2 + $0x8] sm:$0x3]  ;;  %v5011_v56 = vld [vmem:[#allocation2 + $0xa] sm:$0x3]  ;;  %v5012_v63 = vld [vmem:[#allocation2 + $0xc] sm:$0x3] }
 0x5bd   : > { %v3539_v17 = vrot.slane %v3531_v3, %v5408_v0  ;;  %v3555_v18 = vrot.slane %v3547_v4, %v5408_v0  ;;  %v3471_v19 = vrot.slane %v3463_v13, %v5408_v0  ;;  %v3487_v20 = vrot.slane %v3479_v14, %v5408_v0  ;;  %v5013_v1 = vld [vmem:[#allocation2 + $0xe] sm:$0x3]  ;;  %v5014_v13 = vld [vmem:[#allocation2] sm:$0x3] }
 0x5be   : > { %v3546_v21 = vrot.slane %v3532_v58, %v5408_v0  ;;  %v3562_v10 = vrot.slane %v3548_v15, %v5408_v0  ;;  %v3478_v23 = vrot.slane %v3464_v60, %v5408_v0  ;;  %v3494_v40 = vrot.slane %v3480_v16, %v5408_v0  ;;  %v5015_v58 = vld [vmem:[#allocation2 + $0x2] sm:$0x3]  ;;  %v5016_v60 = vld [vmem:[#allocation2 + $0x4] sm:$0x3] }
 0x5bf   : > { %v3564_v38 = vcombine.high %v3539_v17, %v3555_v18  ;;  %v3496_v24 = vcombine.high %v3471_v19, %v3487_v20  ;;  %v3563_v26 = vcombine.low %v3539_v17, %v3555_v18  ;;  %v3495_v27 = vcombine.low %v3471_v19, %v3487_v20 }
 0x5c0   : > { %v3565_v5 = vcombine.low %v3546_v21, %v3562_v10  ;;  %v3497_v59 = vcombine.low %v3478_v23, %v3494_v40  ;;  %v3566_v22 = vcombine.high %v3546_v21, %v3562_v10  ;;  %v3498_v29 = vcombine.high %v3478_v23, %v3494_v40 }
 0x5c1   : > { %3571 = vrot.lane.b32.xlu1 %v3564_v38, %s5089_s24  ;;  %3569 = vrot.lane.b32.xlu0 %v3496_v24, %s5089_s24 }
 0x5c5   : > { %3579 = vrot.lane.b32.xlu1 %v3565_v5, %s5090_s14  ;;  %3577 = vrot.lane.b32.xlu0 %v3497_v59, %s5090_s14 }
 0x5c9   : > { %3587 = vrot.lane.b32.xlu1 %v3566_v22, %s5091_s26  ;;  %3585 = vrot.lane.b32.xlu0 %v3498_v29, %s5091_s26 }
 0x633   : > { %v3572_v7 = vpop.permute.xlu1 %3571  ;;  %v3570_v0 = vpop.permute.xlu0 %3569 }
 0x634   : > { %v3592_v31 = vsel %vm2014_vm3, %v3563_v26, %v3572_v7  ;;  %v3591_v6 = vsel %vm2014_vm3, %v3495_v27, %v3570_v0 }
 0x637   : > { %v3580_v9 = vpop.permute.xlu1 %3579  ;;  %v3578_v30 = vpop.permute.xlu0 %3577 }
 0x638   : > { %v3595_v28 = vsel %vm3593_vm4, %v3592_v31, %v3580_v9  ;;  %v3594_v8 = vsel %vm3593_vm4, %v3591_v6, %v3578_v30 }
 0x63b   : > { %v3588_v32 = vpop.permute.xlu1 %3587  ;;  %v3586_v33 = vpop.permute.xlu0 %3585 }
 0x63c   : > { %v3598_v34 = vsel %vm3596_vm5, %v3595_v28, %v3588_v32  ;;  %v3597_v35 = vsel %vm3596_vm5, %v3594_v8, %v3586_v33 }
 0x63d   : > { %4858 = vmatprep.mubr.msk.f32.mxu1 %vm708_vm1, %v3597_v35 }
 0x63e   : > { %4859 = vmatmul.mubr.msk.f32.vlgmr.msra.gmra.mxu1 %vm708_vm1, %v3598_v34 }
 0x6fe   : > { %v4860_v37 = vpop.f32.mrf.mxu1 }
 0x6ff   : > { %v3688_v51 = vadd.f32 %v4860_v37, %v4671_v36 }
 0x700   : > { %v3682_v39 = vpop.f32.mrf.mxu1 }
 0x701   : > { %v3710_v54 = vcombine.high %v3688_v51, %v3688_v51  ;;  %v3717_v42 = vrot.slane %v3688_v51, %v5272_v25  ;;  %v3683_v43 = vadd.f32 %v4671_v36, %v3682_v39 }
 0x703   : > { %v3724_v44 = vrot.slane %v3710_v54, %v5272_v25  ;;  %v3725_v45 = vcombine.high %v3717_v42, %v3717_v42  ;;  %v3693_v50 = vcombine.high %v3683_v43, %v3683_v43  ;;  %v3700_v52 = vrot.slane %v3683_v43, %v5272_v25 }
 0x704   : > { %v5708_v57 = vadd.f32 %v5010_v53, %v3717_v42 }
 0x705   : > { %v3726_v55 = vcombine.high %v3724_v44, %v3724_v44  ;;  %v5710_v62 = vadd.f32 %v5011_v56, %v3725_v45  ;;  %v3707_v11 = vrot.slane %v3693_v50, %v5272_v25  ;;  %v3708_v12 = vcombine.high %v3700_v52, %v3700_v52 }
 0x706   : > { %v5713_v41 = vadd.f32 %v5012_v63, %v3724_v44  ;;  %v5719_v14 = vadd.f32 %v5014_v13, %v3700_v52 }
 0x707   : > { %v5715_v2 = vadd.f32 %v5013_v1, %v3726_v55  ;;  %v3709_v3 = vcombine.high %v3707_v11, %v3707_v11  ;;  %v3770_v4 = vcombine.low %v5708_v57, %v5710_v62  ;;  %v5721_v15 = vadd.f32 %v5015_v58, %v3708_v12 }
 0x708   : > { %v5723_v16 = vadd.f32 %v5016_v60, %v3707_v11 }
 0x709   : > { %v5725_v17 = vadd.f32 %v5017_v61, %v3709_v3  ;;  %v3771_v18 = vcombine.low %v5713_v41, %v5715_v2  ;;  %v3753_v19 = vcombine.low %v5719_v14, %v5721_v15  ;;  %v3778_v20 = vrot.slane %v3770_v4, %v5272_v25 }
 0x70b   : > { %v3785_v21 = vrot.slane %v3771_v18, %v5272_v25  ;;  %v3754_v10 = vcombine.low %v5723_v16, %v5725_v17  ;;  %v3761_v40 = vrot.slane %v3753_v19, %v5272_v25  ;;  %v4080_v18 = vld [vmem:[%s5228_s3 + $0x18] sm:$0xff]  ;;  %v4079_v19 = vld [vmem:[%s5228_s3 + $0x10] sm:$0xff] }
 0x70c   : > { %4861 = vmatprep.subr.mxu1 %v4080_v18 }
 0x70d   : > { %v3786_v23 = vcombine.low %v3778_v20, %v3785_v21  ;;  %v3768_v38 = vrot.slane %v3754_v10, %v5272_v25  ;;  %4862 = vmatpush3.msra.mxu1 %v4080_v18  ;;  %v4078_v20 = vld [vmem:[%s5228_s3 + $0x8] sm:$0xff]  ;;  %v4077_v21 = vld [vmem:[%s5228_s3] sm:$0xff] }
 0x70e   : > { %4863 = vmatprep.subr.mxu1 %v4079_v19 }
 0x70f   : > { %v3792_v24 = vsel %vm708_vm1, %v3786_v23, 0.0  ;;  %v3769_v26 = vcombine.low %v3761_v40, %v3768_v38  ;;  %4864 = vmatpush3.msra.mxu1 %v4079_v19 }
 0x710   : > { %3793 = vadd.xlane.f32.xlu1 %v3792_v24  ;;  %4865 = vmatprep.subr.mxu1 %v4078_v20 }
 0x711   : > { %v3789_v27 = vsel %vm708_vm1, %v3769_v26, 0.0  ;;  %4866 = vmatpush3.msra.mxu1 %v4078_v20 }
 0x712   : > { %3790 = vadd.xlane.f32.xlu0 %v3789_v27  ;;  %4867 = vmatprep.subr.mxu1 %v4077_v21  ;;  %v4674_v27 = vld [vmem:[%s613_s27] ss:$0 sm:$0xff] }
 0x713   : > { %4868 = vmatpush3.msra.mxu1 %v4077_v21 }
 0x799   : > { %v3794_v5 = vpop.xlane.xlu1 %3793 }
 0x79a   : > { %v3796_v59 = vmul.f32 0.03125, %v3794_v5  ;;  %v4675_v5 = vld [vmem:[%s616_s23] ss:$0 sm:$0xff] }
 0x79b   : > { %v3791_v22 = vpop.xlane.xlu0 %3790 }
 0x79c   : > { %v3833_v29 = vrot.slane %v3796_v59, %v5281_v46  ;;  %v3840_v7 = vrot.slane %v3796_v59, %v5284_v47  ;;  %v3847_v0 = vrot.slane %v3796_v59, %v5287_v48  ;;  %v3854_v9 = vrot.slane %v3796_v59, %v5290_v49 }
 0x79d   : > { %v3795_v30 = vmul.f32 0.03125, %v3791_v22  ;;  %v4014_v59 = vcombine.high %v4674_v27, %v4674_v27  ;;  %v4021_v22 = vrot.slane %v4674_v27, %v5272_v25 }
 0x79e   : > { %v5744_v31 = vsub.f32 %v5708_v57, %v3833_v29  ;;  %v5747_v6 = vsub.f32 %v5710_v62, %v3840_v7  ;;  %v5750_v28 = vsub.f32 %v5713_v41, %v3847_v0  ;;  %v5753_v8 = vsub.f32 %v5715_v2, %v3854_v9 }
 0x79f   : > { %v3805_v32 = vrot.slane %v3795_v30, %v5281_v46  ;;  %v3812_v33 = vrot.slane %v3795_v30, %v5284_v47  ;;  %v3819_v34 = vrot.slane %v3795_v30, %v5287_v48  ;;  %v3826_v35 = vrot.slane %v3795_v30, %v5290_v49 }
 0x7a0   : > { %v3875_v36 = vmul.f32 %v5744_v31, %v5744_v31  ;;  %v3876_v37 = vmul.f32 %v5747_v6, %v5747_v6  ;;  %v3877_v51 = vmul.f32 %v5750_v28, %v5750_v28  ;;  %v3878_v39 = vmul.f32 %v5753_v8, %v5753_v8 }
 0x7a1   : > { %v3863_v54 = vsub.f32 %v5719_v14, %v3805_v32  ;;  %v3864_v42 = vsub.f32 %v5721_v15, %v3812_v33  ;;  %v3865_v43 = vsub.f32 %v5723_v16, %v3819_v34  ;;  %v3866_v44 = vsub.f32 %v5725_v17, %v3826_v35 }
 0x7a2   : > { %v3904_v45 = vcombine.low %v3875_v36, %v3876_v37  ;;  %v3905_v50 = vcombine.low %v3877_v51, %v3878_v39  ;;  %v4048_v29 = vcombine.high %v4675_v5, %v4675_v5  ;;  %v4028_v7 = vrot.slane %v4014_v59, %v5272_v25  ;;  %v4239_v59 = vld [vmem:[%s5238_s17 + $0x70] sm:$0xff] }
 0x7a3   : > { %v3871_v52 = vmul.f32 %v3863_v54, %v3863_v54  ;;  %v3872_v55 = vmul.f32 %v3864_v42, %v3864_v42  ;;  %v3873_v53 = vmul.f32 %v3865_v43, %v3865_v43  ;;  %v3874_v56 = vmul.f32 %v3866_v44, %v3866_v44 }
 0x7a4   : > { %v3912_v3 = vrot.slane %v3904_v45, %v5272_v25  ;;  %v3919_v4 = vrot.slane %v3905_v50, %v5272_v25  ;;  %v4055_v0 = vrot.slane %v4675_v5, %v5272_v25  ;;  %v4029_v30 = vcombine.high %v4021_v22, %v4021_v22  ;;  %v4240_v5 = vld [vmem:[%s5238_s17 + $0x78] sm:$0xff] }
 0x7a5   : > { %v3887_v11 = vcombine.low %v3871_v52, %v3872_v55  ;;  %v3888_v12 = vcombine.low %v3873_v53, %v3874_v56  ;;  %v4062_v32 = vrot.slane %v4048_v29, %v5272_v25  ;;  %v4030_v37 = vcombine.high %v4028_v7, %v4028_v7  ;;  %4872 = vmatprep.subr.mxu0 %v4240_v5  ;;  %v4237_v29 = vld [vmem:[%s5238_s17 + $0x60] sm:$0xff] }
 0x7a6   : > { %v3920_v60 = vcombine.low %v3912_v3, %v3919_v4  ;;  %v4063_v51 = vcombine.high %v4055_v0, %v4055_v0  ;;  %4873 = vmatpush3.msra.mxu0 %v4240_v5 }
 0x7a7   : > { %v3895_v63 = vrot.slane %v3887_v11, %v5272_v25  ;;  %v3902_v1 = vrot.slane %v3888_v12, %v5272_v25  ;;  %v4064_v53 = vcombine.high %v4062_v32, %v4062_v32  ;;  %4874 = vmatprep.subr.mxu0 %v4239_v59 }
 0x7a8   : > { %v3926_v61 = vsel %vm708_vm1, %v3920_v60, 0.0  ;;  %4875 = vmatpush3.msra.mxu0 %v4239_v59 }
 0x7a9   : > { %v3903_v13 = vcombine.low %v3895_v63, %v3902_v1 }
 0x7ab   : > { %v3923_v58 = vsel %vm708_vm1, %v3903_v13, 0.0 }
 0x7ac   : > { %3924 = vadd.xlane.f32.xlu0 %v3923_v58 }
 0x7b0   : > { %3927 = vadd.xlane.f32.xlu0 %v3926_v61 }
 0x835   : > { %v3925_v10 = vpop.xlane.xlu0 %3924 }
 0x836   : > { %v3929_v23 = vmul.f32 0.03125, %v3925_v10 }
 0x838   : > { %v3931_v40 = vadd.f32 1e-05, %v3929_v23 }
 0x839   : > { %v3928_v38 = vpop.xlane.xlu0 %3927 }
 0x83a   : > { %4998 = vrsqrt.f32 %v3931_v40  ;;  %v3930_v24 = vmul.f32 0.03125, %v3928_v38 }
 0x83c   : > { %v3932_v26 = vadd.f32 1e-05, %v3930_v24 }
 0x83e   : > { %5000 = vrsqrt.f32 %v3932_v26 }
 0x847   : > { %v4999_v9 = vpop.eup %4998 }
 0x848   : > { %v3943_v33 = vrot.slane %v4999_v9, %v5281_v46  ;;  %v3950_v34 = vrot.slane %v4999_v9, %v5284_v47  ;;  %v3957_v35 = vrot.slane %v4999_v9, %v5287_v48  ;;  %v3964_v36 = vrot.slane %v4999_v9, %v5290_v49  ;;  %v4234_v9 = vld [vmem:[%s5238_s17 + $0x48] sm:$0xff] }
 0x84a   : > { %v4001_v39 = vmul.f32 %v3943_v33, %v3863_v54  ;;  %v4002_v45 = vmul.f32 %v3950_v34, %v3864_v42  ;;  %v4003_v50 = vmul.f32 %v3957_v35, %v3865_v43  ;;  %v4004_v52 = vmul.f32 %v3964_v36, %v3866_v44  ;;  %v4231_v33 = vld [vmem:[%s5238_s17 + $0x30] sm:$0xff]  ;;  %v4230_v34 = vld [vmem:[%s5238_s17 + $0x28] sm:$0xff]  ;;  %v4229_v35 = vld [vmem:[%s5238_s17 + $0x20] sm:$0xff] }
 0x84b   : > { %v5001_v55 = vpop.eup %5000  ;;  %v4228_v36 = vld [vmem:[%s5238_s17 + $0x18] sm:$0xff] }
 0x84c   : > { %v3978_v56 = vrot.slane %v5001_v55, %v5284_v47  ;;  %v3992_v11 = vrot.slane %v5001_v55, %v5290_v49  ;;  %v4035_v12 = vmul.f32 %v4021_v22, %v4001_v39  ;;  %v4036_v63 = vmul.f32 %v4029_v30, %v4002_v45  ;;  %v4225_v39 = vld [vmem:[%s5238_s17] sm:$0xff] }
 0x84d   : > { %v4037_v1 = vmul.f32 %v4028_v7, %v4003_v50  ;;  %v4038_v3 = vmul.f32 %v4030_v37, %v4004_v52  ;;  %v3971_v4 = vrot.slane %v5001_v55, %v5281_v46  ;;  %v3985_v13 = vrot.slane %v5001_v55, %v5287_v48  ;;  %v4676_v45 = vld [vmem:[%s624_s5] ss:$0 sm:$0xff] }
 0x84e   : > { %v4006_v58 = vmul.f32 %v3978_v56, %v5747_v6  ;;  %v4008_v54 = vmul.f32 %v3992_v11, %v5753_v8  ;;  %v4069_v42 = vadd.f32 %v4055_v0, %v4035_v12  ;;  %v4070_v43 = vadd.f32 %v4063_v51, %v4036_v63 }
 0x84f   : > { %v4071_v44 = vadd.f32 %v4062_v32, %v4037_v1  ;;  %v4072_v60 = vadd.f32 %v4064_v53, %v4038_v3  ;;  %v4005_v47 = vmul.f32 %v3971_v4, %v5744_v31  ;;  %v4007_v49 = vmul.f32 %v3985_v13, %v5750_v28 }
 0x850   : > { %v4040_v61 = vmul.f32 %v4029_v30, %v4006_v58  ;;  %v4042_v18 = vmul.f32 %v4030_v37, %v4008_v54  ;;  %v4096_v19 = vcombine.low %v4069_v42, %v4070_v43  ;;  %v4233_v30 = vld [vmem:[%s5238_s17 + $0x40] sm:$0xff]  ;;  %v4227_v37 = vld [vmem:[%s5238_s17 + $0x10] sm:$0xff] }
 0x851   : > { %v4097_v20 = vcombine.low %v4071_v44, %v4072_v60  ;;  %v4039_v21 = vmul.f32 %v4021_v22, %v4005_v47  ;;  %v4041_v46 = vmul.f32 %v4028_v7, %v4007_v49  ;;  %v4238_v22 = vld [vmem:[%s5238_s17 + $0x68] sm:$0xff]  ;;  %v4236_v7 = vld [vmem:[%s5238_s17 + $0x58] sm:$0xff]  ;;  %v4681_v44 = vld [vmem:[%s632_s21] ss:$0 sm:$0xff] }
 0x852   : > { %v4074_v48 = vadd.f32 %v4063_v51, %v4040_v61  ;;  %v4076_v10 = vadd.f32 %v4064_v53, %v4042_v18  ;;  %v4104_v6 = vrot.slane %v4096_v19, %v5272_v25  ;;  %4876 = vmatprep.subr.mxu0 %v4238_v22  ;;  %v4226_v51 = vld [vmem:[%s5238_s17 + $0x8] sm:$0xff]  ;;  %v4374_v60 = vcombine.high %v4681_v44, %v4681_v44 }
 0x853   : > { %v4111_v8 = vrot.slane %v4097_v20, %v5272_v25  ;;  %v4073_v23 = vadd.f32 %v4055_v0, %v4039_v21  ;;  %v4075_v40 = vadd.f32 %v4062_v32, %v4041_v46  ;;  %4877 = vmatpush3.msra.mxu0 %v4238_v22  ;;  %v4235_v0 = vld [vmem:[%s5238_s17 + $0x50] sm:$0xff]  ;;  %v4232_v32 = vld [vmem:[%s5238_s17 + $0x38] sm:$0xff]  ;;  %v4381_v47 = vrot.slane %v4681_v44, %v5272_v25 }
 0x854   : > { %4878 = vmatprep.subr.mxu0 %v4237_v29  ;;  %v4388_v61 = vrot.slane %v4374_v60, %v5272_v25 }
 0x855   : > { %v4112_v31 = vcombine.low %v4104_v6, %v4111_v8  ;;  %v4113_v38 = vcombine.low %v4073_v23, %v4074_v48  ;;  %v4114_v28 = vcombine.low %v4075_v40, %v4076_v10  ;;  %4879 = vmatpush3.msra.mxu0 %v4237_v29  ;;  %v4389_v20 = vcombine.high %v4381_v47, %v4381_v47 }
 0x856   : > { %4880 = vmatprep.subr.mxu0 %v4236_v7  ;;  %v4390_v8 = vcombine.high %v4388_v61, %v4388_v61 }
 0x857   : > { %4869 = vmatprep.mubr.msk.f32.mxu1 %vm708_vm1, %v4112_v31  ;;  %v4121_v24 = vrot.slane %v4113_v38, %v5272_v25  ;;  %v4128_v26 = vrot.slane %v4114_v28, %v5272_v25  ;;  %4881 = vmatpush3.msra.mxu0 %v4236_v7 }
 0x858   : > { %4882 = vmatprep.subr.mxu0 %v4235_v0 }
 0x859   : > { %v4129_v27 = vcombine.low %v4121_v24, %v4128_v26  ;;  %4883 = vmatpush3.msra.mxu0 %v4235_v0 }
 0x85a   : > { %4884 = vmatprep.subr.mxu0 %v4234_v9 }
 0x85b   : > { %4870 = vmatmul.mubr.msk.f32.vlgmr.msra.gmra.mxu1 %vm708_vm1, %v4129_v27  ;;  %4885 = vmatpush3.msra.mxu0 %v4234_v9 }
 0x85c   : > { %4886 = vmatprep.subr.mxu0 %v4233_v30 }
 0x85d   : > { %4887 = vmatpush3.msra.mxu0 %v4233_v30 }
 0x85e   : > { %4888 = vmatprep.subr.mxu0 %v4232_v32 }
 0x85f   : > { %4889 = vmatpush3.msra.mxu0 %v4232_v32 }
 0x860   : > { %4890 = vmatprep.subr.mxu0 %v4231_v33 }
 0x861   : > { %4891 = vmatpush3.msra.mxu0 %v4231_v33 }
 0x862   : > { %4892 = vmatprep.subr.mxu0 %v4230_v34 }
 0x863   : > { %4893 = vmatpush3.msra.mxu0 %v4230_v34 }
 0x864   : > { %4894 = vmatprep.subr.mxu0 %v4229_v35 }
 0x865   : > { %4895 = vmatpush3.msra.mxu0 %v4229_v35 }
 0x866   : > { %4896 = vmatprep.subr.mxu0 %v4228_v36 }
 0x867   : > { %4897 = vmatpush3.msra.mxu0 %v4228_v36 }
 0x868   : > { %4898 = vmatprep.subr.mxu0 %v4227_v37 }
 0x869   : > { %4899 = vmatpush3.msra.mxu0 %v4227_v37 }
 0x86a   : > { %4900 = vmatprep.subr.mxu0 %v4226_v51 }
 0x86b   : > { %4901 = vmatpush3.msra.mxu0 %v4226_v51 }
 0x86c   : > { %4902 = vmatprep.subr.mxu0 %v4225_v39 }
 0x86d   : > { %4903 = vmatpush3.msra.mxu0 %v4225_v39 }
 0x91b   : > { %v4871_v50 = vpop.f32.mrf.mxu1 }
 0x91c   : > { %v4206_v52 = vadd.f32 %v4871_v50, %v4676_v45 }
 0x91d   : > { %v4200_v55 = vpop.f32.mrf.mxu1 }
 0x91e   : > { %v4680_v53 = vmul.f32 -1.702, %v4206_v52  ;;  %v4201_v56 = vadd.f32 %v4676_v45, %v4200_v55 }
 0x920   : > { %v4215_v11 = vmul.f32 1.442695, %v4680_v53  ;;  %v4679_v12 = vmul.f32 -1.702, %v4201_v56 }
 0x922   : > { %5002 = vpow2.f32 %v4215_v11  ;;  %v4213_v63 = vmul.f32 1.442695, %v4679_v12 }
 0x924   : > { %5004 = vpow2.f32 %v4213_v63 }
 0x92f   : > { %v5003_v1 = vpop.eup %5002 }
 0x930   : > { %v4218_v3 = vadd.f32 1.0, %v5003_v1 }
 0x931   : > { %v5005_v4 = vpop.eup %5004 }
 0x932   : > { %v4217_v13 = vadd.f32 1.0, %v5005_v4  ;;  %5006 = vrcp.f32 %v4218_v3 }
 0x934   : > { %5008 = vrcp.f32 %v4217_v13 }
 0x93f   : > { %v5007_v58 = vpop.eup %5006 }
 0x940   : > { %v4224_v43 = vmul.f32 %v5007_v58, %v4206_v52 }
 0x941   : > { %v5009_v54 = vpop.eup %5008 }
 0x942   : > { %v4223_v42 = vmul.f32 %v5009_v54, %v4201_v56 }
 0x944   : > { %4904 = vmatprep.mubr.f32.mxu0 %v4223_v42 }
 0x945   : > { %4905 = vmatmul.mubr.f32.vlgmr.msra.gmra.mxu0 %v4224_v43 }
 0xa05   : > { %v4906_v49 = vpop.f32.mrf.mxu0 }
 0xa06   : > { %v4335_v18 = vcombine.high %v4906_v49, %v4906_v49  ;;  %v4342_v19 = vrot.slane %v4906_v49, %v5272_v25 }
 0xa07   : > { %v4307_v21 = vpop.f32.mrf.mxu0 }
 0xa08   : > { %v4349_v46 = vrot.slane %v4335_v18, %v5272_v25  ;;  %v4350_v48 = vcombine.high %v4342_v19, %v4342_v19  ;;  %v4364_v10 = vadd.f32 %v4342_v19, %v5708_v57  ;;  %v4318_v6 = vcombine.high %v4307_v21, %v4307_v21 }
 0xa09   : > { %v4325_v23 = vrot.slane %v4307_v21, %v5272_v25 }
 0xa0a   : > { %v4351_v40 = vcombine.high %v4349_v46, %v4349_v46  ;;  %v4365_v31 = vadd.f32 %v4350_v48, %v5710_v62  ;;  %v4366_v38 = vadd.f32 %v4349_v46, %v5713_v41  ;;  %v4399_v28 = vadd.f32 %v4381_v47, %v4364_v10 }
 0xa0b   : > { %v4332_v24 = vrot.slane %v4318_v6, %v5272_v25  ;;  %v4333_v26 = vcombine.high %v4325_v23, %v4325_v23  ;;  %v4360_v27 = vadd.f32 %v4325_v23, %v5719_v14 }
 0xa0c   : > { %v4367_v5 = vadd.f32 %v4351_v40, %v5715_v2  ;;  %v4400_v59 = vadd.f32 %v4389_v20, %v4365_v31  ;;  %v4401_v57 = vadd.f32 %v4388_v61, %v4366_v38  ;;  %4408 = vst.msk [vmem:[#allocation2 + $0x8] sm:$0x3] %vm4403_vm6, %v4399_v28 }
 0xa0d   : > { %v4334_v22 = vcombine.high %v4332_v24, %v4332_v24  ;;  %v4361_v29 = vadd.f32 %v4333_v26, %v5721_v15  ;;  %v4362_v7 = vadd.f32 %v4332_v24, %v5723_v16  ;;  %v4395_v62 = vadd.f32 %v4381_v47, %v4360_v27 }
 0xa0e   : > { %v4402_v0 = vadd.f32 %v4390_v8, %v4367_v5  ;;  %4409 = vst.msk [vmem:[#allocation2 + $0xa] sm:$0x3] %vm4403_vm6, %v4400_v59  ;;  %4410 = vst.msk [vmem:[#allocation2 + $0xc] sm:$0x3] %vm4403_vm6, %v4401_v57 }
 0xa0f   : > { %v4363_v25 = vadd.f32 %v4334_v22, %v5725_v17  ;;  %v4396_v41 = vadd.f32 %v4389_v20, %v4361_v29  ;;  %v4397_v14 = vadd.f32 %v4388_v61, %v4362_v7  ;;  %4404 = vst.msk [vmem:[#allocation2] sm:$0x3] %vm4403_vm6, %v4395_v62  ;;  %4415 = sbr.rel (%p4682_p6) target bundleno = 2584 (0xa18), region = 80 }
 0xa10   : > { %4411 = vst.msk [vmem:[#allocation2 + $0xe] sm:$0x3] %vm4403_vm6, %v4402_v0 }
 0xa11   : > { %v4398_v2 = vadd.f32 %v4390_v8, %v4363_v25  ;;  %4405 = vst.msk [vmem:[#allocation2 + $0x2] sm:$0x3] %vm4403_vm6, %v4396_v41  ;;  %4406 = vst.msk [vmem:[#allocation2 + $0x4] sm:$0x3] %vm4403_vm6, %v4397_v14 }
 0xa13   : > { %4407 = vst.msk [vmem:[#allocation2 + $0x6] sm:$0x3] %vm4403_vm6, %v4398_v2 }
 0xa14   : > { %4416 = vst.msk [vmem:[#allocation3] sm:$0x3] %vm4403_vm6, %v4395_v62  ;;  %4417 = vst.msk [vmem:[#allocation3 + $0x2] sm:$0x3] %vm4403_vm6, %v4396_v41 }
 0xa15   : > { %4418 = vst.msk [vmem:[#allocation3 + $0x4] sm:$0x3] %vm4403_vm6, %v4397_v14  ;;  %4419 = vst.msk [vmem:[#allocation3 + $0x6] sm:$0x3] %vm4403_vm6, %v4398_v2 }
 0xa16   : > { %4420 = vst.msk [vmem:[#allocation3 + $0x8] sm:$0x3] %vm4403_vm6, %v4399_v28  ;;  %4421 = vst.msk [vmem:[#allocation3 + $0xa] sm:$0x3] %vm4403_vm6, %v4400_v59 }
 0xa17   : > { %4422 = vst.msk [vmem:[#allocation3 + $0xc] sm:$0x3] %vm4403_vm6, %v4401_v57  ;;  %4423 = vst.msk [vmem:[#allocation3 + $0xe] sm:$0x3] %vm4403_vm6, %v4402_v0 }
 0xa18 PF: > { %s5927_s30 = sld [smem:[#allocation7_spill]]  ;;  %s5092_s21 = smov [#allocation3]  }
 0xa19   : > { %s4432_s22 = sshll.u32 %s5092_s21, 4  ;;  %s4433_s22 = int_to_ptr.vmem [resolvable:$true] %s4432_s22 }
 0xa1a   : > { %s5018_s20 = scalar_lea.vmem %s4433_s22, 256  ;;  %p5025_p11 = scmp.lt.s32.totalorder %s4433_s22, %s4433_s22 }
 0xa1b   : > { %p5019_p8 = scmp.ne.s32.totalorder %s4433_s22, %s5018_s20  ;;  %p5026_p12 = scmp.lt.s32.totalorder %s5018_s20, %s5018_s20 }
 0xa1d   : > { %p5027_p13 = por %p5026_p12, %p5025_p11 }
 0xa1e   : > { %s5928_s25 = sadd.s32 4294967295, %s5927_s30  }
 0xa1f   : > { %p5872_p7 = scmp.eq.s32.totalorder %s5928_s25, 1 }
 0xa21   : > { %p5020_p9 = pnand %p5019_p8, %p5872_p7 }
 0xa23   : > { %p5021_p10 = pneg %p5020_p9 }
 0xa25   : > { %p5028_p0 = pnand %p5027_p13, %p5021_p10 }
 0xa27   : > { %5031 = shalt.err (!%p5028_p0)
}
 0xa28   : > { %s5093_s24 = smov 32   ;;  %s5094_s14 = smov 2  }
 0xa29   : > { %s5930_s29 = sld [smem:[#allocation12_spill]] }
 0xa2f   : > { %4908 = dma.vmem_to_hbm [thread:$0]  (%p5872_p7), %s4433_s22, 256, %s5930_s29, [#allocation4], %s5093_s24, %s5093_s24, %s5094_s14  }
 0xa30   : > { %5055 = dma.done.wait (%p5872_p7), [#allocation4], 256  }
 0xa31   : > { %5057 = vsyncadd (%p5872_p7), [#allocation4], 4294967040 }
 0xa32 PF: > { %s5931_s13 = sld [smem:[#allocation7_spill]] }
 0xa33   : > { %s5932_s25 = sld [smem:[#allocation6_spill]] }
 0xa34   : > { %s5933_s26 = sld [smem:[#allocation8_spill]] }
 0xa38   : > { %s24_s27 = sadd.s32 1, %s5931_s13  }
 0xa39   : > { %p21_p1 = scmp.ge.s32.totalorder %s24_s27, 4  }
 0xa3b   :  { %23 = sbr.rel (!%p21_p1) target bundleno = 6 (0x6), region = 144 }
 0xa40   :  { %4448 = vsyncpa [#allocation4], 1 }
 0xa41   :  { %4450 = vsyncpa [#allocation4 + $0x1], 1 }

</bundles_post_ra>
